<compile_context>
chip_gen: v6e
topology: v6e:2x2x1
jax: 0.10.0
libtpu: 0.0.40
codegen_flags: <defaults>
</compile_context>

<pallas_src>
from functools import partial

import jax
import jax.numpy as jnp
from jax import lax
from jax.experimental import pallas as pl
from jax.experimental.pallas import tpu as pltpu


def _round_up(x, m):
    return ((x + m - 1) // m) * m


def _sigmoid(x):
    # One EUP op (tanh) instead of exp + reciprocal on the serial recurrent path.
    return 0.5 * jnp.tanh(0.5 * x) + 0.5


def _vmem_limit_bytes():
    """Generation-aware scoped-VMEM limit (~75% of physical, capped at 64 MiB)."""
    try:
        cap = pltpu.get_tpu_info().vmem_capacity_bytes
    except Exception:
        cap = 64 * 1024 * 1024          # conservative fallback (v7x physical size)
    return min((cap * 3) // 4, 64 * 1024 * 1024)


# ----------------------------------------------------------------------------
# Recurrence kernel: T_blk timesteps per grid step + fused final Linear
# ----------------------------------------------------------------------------
def lstm_block_kernel(gx_ref, whh_ref, wfc_ref, bfc_ref, q_ref, h_sc, c_sc,
                      *, t_real, t_blk):
    """gx_ref:  (T_blk, B_tile, 4*Hp) f32  pre-projected gate-x slab for this block
    whh_ref: (Hp, 4*Hp) bf16   wfc_ref: (Hp, A_pad) bf16   bfc_ref: (1, A_pad) f32
    q_ref:   (B_tile, A_pad) f32 output (written on the last time block only)
    h_sc, c_sc: (B_tile, Hp) f32 VMEM scratch carrying LSTM state across time blocks.
    """
    tb = pl.program_id(1)               # time-block index (serial axis)
    hp = whh_ref.shape[0]

    @pl.when(tb == 0)
    def _init():
        h_sc[...] = jnp.zeros_like(h_sc)
        c_sc[...] = jnp.zeros_like(c_sc)

    whh = whh_ref[...]
    need_mask = (t_real % t_blk) != 0   # static: only ragged last block pays for it
    base = tb * t_blk

    def step(s, carry):
        h, c = carry
        # Only the recurrent matmul stays on the critical path.
        gates = gx_ref[s] + jnp.dot(h.astype(whh.dtype), whh,
                                    preferred_element_type=jnp.float32)
        # Lane-aligned gate blocks (each gate owns a full Hp = k*128 lane tile).
        i_g = _sigmoid(gates[:, 0 * hp:1 * hp])
        f_g = _sigmoid(gates[:, 1 * hp:2 * hp])
        g_g = jnp.tanh(gates[:, 2 * hp:3 * hp])
        o_g = _sigmoid(gates[:, 3 * hp:4 * hp])
        c_new = f_g * c + i_g * g_g
        h_new = o_g * jnp.tanh(c_new)
        if need_mask:
            valid = (base + s) < t_real
            h_new = jnp.where(valid, h_new, h)
            c_new = jnp.where(valid, c_new, c)
        return (h_new, c_new)

    h, c = lax.fori_loop(0, t_blk, step, (h_sc[...], c_sc[...]), unroll=True)
    h_sc[...] = h
    c_sc[...] = c

    @pl.when(tb == pl.num_programs(1) - 1)
    def _finalize():
        q_ref[...] = (
            jnp.dot(h.astype(wfc_ref.dtype), wfc_ref[...],
                    preferred_element_type=jnp.float32)
            + bfc_ref[...]
        ).astype(q_ref.dtype)


# ----------------------------------------------------------------------------
# Parameter handling
# ----------------------------------------------------------------------------
def init_params(key, vocab_size, embedding_dim, hidden_dim, action_size):
    """Logical (unpadded) params matching PyTorch layout, stored transposed."""
    ks = jax.random.split(key, 7)
    h = hidden_dim
    bound = 1.0 / jnp.sqrt(jnp.float32(h))
    u = lambda k, shape: jax.random.uniform(k, shape, jnp.float32, -bound, bound)
    return {
        "embedding": jax.random.normal(ks[0], (vocab_size, embedding_dim), jnp.float32),
        "w_ih_t": u(ks[1], (embedding_dim, 4 * h)),        # (E, 4H)
        "w_hh_t": u(ks[2], (h, 4 * h)),                    # (H, 4H)
        "b": u(ks[3], (1, 4 * h)) + u(ks[4], (1, 4 * h)),  # b_ih + b_hh
        "w_fc_t": u(ks[5], (h, action_size)),              # (H, A)
        "b_fc": u(ks[6], (1, action_size)),
    }


def pad_params(params):
    """Fold embedding @ W_ih + b into a per-token gate table G (V, 4*Hp) and pad
    H / A to lane multiples (128).  Padded gate columns have zero weights/bias, so
    padded h/c lanes stay exactly 0.  Matmul weights cast to bf16 (f32 accumulate)."""
    emb = params["embedding"]
    e, four_h = params["w_ih_t"].shape
    h = four_h // 4
    a = params["w_fc_t"].shape[1]
    hp = _round_up(h, 128)
    ap = _round_up(a, 128)

    def pad_gate_cols(w):  # (rows, 4H) -> (rows, 4*Hp), gate k at cols [k*Hp, k*Hp+H)
        out = jnp.zeros((w.shape[0], 4 * hp), w.dtype)
        for k in range(4):
            out = out.at[:, k * hp:k * hp + h].set(w[:, k * h:(k + 1) * h])
        return out

    # Folded gate table: exactly the per-token input-projection term the recurrence
    # needs (bf16 MXU operands, f32 accumulation -- same policy as the reference).
    g_unpadded = jnp.dot(emb.astype(jnp.bfloat16),
                         params["w_ih_t"].astype(jnp.bfloat16),
                         preferred_element_type=jnp.float32) + params["b"]   # (V, 4H)
    g_table = pad_gate_cols(g_unpadded)                                      # (V, 4Hp) f32

    w_hh_p = jnp.zeros((hp, 4 * hp), jnp.float32)
    w_hh_p = w_hh_p.at[:h, :].set(pad_gate_cols(params["w_hh_t"]))
    w_hh_p = w_hh_p.astype(jnp.bfloat16)                                     # (Hp, 4Hp)
    w_fc_p = jnp.zeros((hp, ap), jnp.float32)
    w_fc_p = w_fc_p.at[:h, :a].set(params["w_fc_t"]).astype(jnp.bfloat16)    # (Hp, Ap)
    b_fc_p = jnp.zeros((1, ap), jnp.float32).at[:, :a].set(params["b_fc"])   # (1, Ap)

    return {
        "g_table": g_table, "w_hh_p": w_hh_p, "w_fc_p": w_fc_p, "b_fc_p": b_fc_p,
        "H": h, "A": a, "Hp": hp, "Ap": ap,
    }


# ----------------------------------------------------------------------------
# Forward pass
# ----------------------------------------------------------------------------
def dqn_forward_pallas(state, pparams):
    """state: (B, T) int32 token ids. Returns q_values (B, action_size) f32."""
    g_tbl = pparams["g_table"]
    hp, ap, a_real = pparams["Hp"], pparams["Ap"], pparams["A"]
    b_dim, t_dim = state.shape

    # Batch padding / tiling: 2 "parallel" batch tiles when B is big enough so both
    # v7x TensorCores work during the recurrence; otherwise a single tile.
    b_pad = _round_up(max(b_dim, 8), 8)
    if b_pad >= 16:
        b_tile = _round_up((b_pad + 1) // 2, 8)
        b_pad = 2 * b_tile
        nb = 2
    else:
        b_tile = b_pad
        nb = 1

    # Time blocking: amortize per-grid-step overhead; cap the gx block VMEM footprint.
    t_blk = min(16, t_dim)
    gx_step_bytes = b_tile * 4 * hp * 4
    t_blk = max(1, min(t_blk, (8 * 1024 * 1024) // max(gx_step_bytes, 1)))
    t_pad = _round_up(t_dim, t_blk)
    n_tb = t_pad // t_blk

    # Per-token gate-x term is a pure row gather of the folded gate table, gathered
    # directly into time-major layout (T_pad, B_pad, 4*Hp), f32.
    state_p = jnp.pad(state, ((0, b_pad - b_dim), (0, t_pad - t_dim)))
    gx = jnp.take(g_tbl, state_p.T, axis=0)

    rec_cost = pl.CostEstimate(
        flops=2 * t_dim * b_pad * hp * 4 * hp + 2 * b_pad * hp * ap,
        transcendentals=5 * t_dim * b_pad * hp,
        bytes_accessed=(t_pad * b_pad * 4 * hp * 4 + hp * 4 * hp * 2
                        + hp * ap * 2 + ap * 4 + b_pad * ap * 4))

    kernel = partial(lstm_block_kernel, t_real=t_dim, t_blk=t_blk)

    q_pad = pl.pallas_call(
        kernel,
        out_shape=jax.ShapeDtypeStruct((b_pad, ap), jnp.float32),
        grid_spec=pltpu.PrefetchScalarGridSpec(
            num_scalar_prefetch=0,
            grid=(nb, n_tb),
            in_specs=[
                pl.BlockSpec((t_blk, b_tile, 4 * hp), lambda b, t: (t, b, 0)),  # gx slab
                pl.BlockSpec((hp, 4 * hp), lambda b, t: (0, 0)),   # W_hh (resident)
                pl.BlockSpec((hp, ap), lambda b, t: (0, 0)),       # W_fc (resident)
                pl.BlockSpec((1, ap), lambda b, t: (0, 0)),        # b_fc (resident)
            ],
            out_specs=pl.BlockSpec((b_tile, ap), lambda b, t: (b, 0)),  # lane-dense q
            scratch_shapes=[
                pltpu.VMEM((b_tile, hp), jnp.float32),   # h state
                pltpu.VMEM((b_tile, hp), jnp.float32),   # c state
            ],
        ),
        compiler_params=pltpu.CompilerParams(
            dimension_semantics=("parallel", "arbitrary"),   # batch parallel, T serial
            vmem_limit_bytes=_vmem_limit_bytes()),
        cost_estimate=rec_cost,
    )(gx, pparams["w_hh_p"], pparams["w_fc_p"], pparams["b_fc_p"])

    return q_pad[:b_dim, :a_real]


# ----------------------------------------------------------------------------
# Pure-JAX reference (same precision policy: bf16 matmul operands, f32 accumulate)
# ----------------------------------------------------------------------------
def dqn_forward_ref(state, params):
    emb = params["embedding"][state]                         # (B, T, E) f32
    b_dim = emb.shape[0]
    h_dim = params["w_hh_t"].shape[0]
    w_ih = params["w_ih_t"].astype(jnp.bfloat16)
    w_hh = params["w_hh_t"].astype(jnp.bfloat16)
    w_fc = params["w_fc_t"].astype(jnp.bfloat16)
    b = params["b"][0]
    b_fc = params["b_fc"][0]

    def step(carry, x_t):
        h, c = carry
        gates = (jnp.dot(x_t.astype(jnp.bfloat16), w_ih,
                         preferred_element_type=jnp.float32) + b
                 + jnp.dot(h.astype(jnp.bfloat16), w_hh,
                           preferred_element_type=jnp.float32))
        i_g = jax.nn.sigmoid(gates[:, 0:h_dim])
        f_g = jax.nn.sigmoid(gates[:, h_dim:2 * h_dim])
        g_g = jnp.tanh(gates[:, 2 * h_dim:3 * h_dim])
        o_g = jax.nn.sigmoid(gates[:, 3 * h_dim:4 * h_dim])
        c = f_g * c + i_g * g_g
        h = o_g * jnp.tanh(c)
        return (h, c), None

    init = (jnp.zeros((b_dim, h_dim), jnp.float32),
            jnp.zeros((b_dim, h_dim), jnp.float32))
    (h_n, _), _ = lax.scan(step, init, jnp.transpose(emb, (1, 0, 2)))
    return jnp.dot(h_n.astype(jnp.bfloat16), w_fc,
                   preferred_element_type=jnp.float32) + b_fc


if __name__ == "__main__":
    vocab_size, embedding_dim, hidden_dim, action_size = 64, 32, 32, 4
    B, T = 2, 8

    key = jax.random.PRNGKey(0)
    pkey, skey = jax.random.split(key)
    params = init_params(pkey, vocab_size, embedding_dim, hidden_dim, action_size)
    state = jax.random.randint(skey, (B, T), 0, vocab_size, dtype=jnp.int32)

    pparams = pad_params(params)
    q_pallas = jax.block_until_ready(dqn_forward_pallas(state, pparams))
    q_ref = jax.block_until_ready(dqn_forward_ref(state, params))

    assert q_pallas.shape == (B, action_size)
    assert jnp.allclose(q_pallas, q_ref, atol=2e-3, rtol=2e-3), (q_pallas, q_ref)
    print("KERNEL_OK")
</pallas_src>

<mosaic_0001>
module attributes {stable_mosaic.version = 11 : i64} {
  func.func @lstm_block_kernel(%arg0: i32, %arg1: i32, %arg2: memref<8x8x512xf32, #tpu.memory_space<vmem>>, %arg3: memref<128x512xbf16, #tpu.memory_space<vmem>>, %arg4: memref<128x128xbf16, #tpu.memory_space<vmem>>, %arg5: memref<1x128xf32, #tpu.memory_space<vmem>>, %arg6: memref<8x128xf32, #tpu.memory_space<vmem>>, %arg7: memref<8x128xf32, #tpu.memory_space<vmem>>, %arg8: memref<8x128xf32, #tpu.memory_space<vmem>>) attributes {dimension_semantics = [#tpu.dimension_semantics<parallel>, #tpu.dimension_semantics<arbitrary>], iteration_bounds = array<i64: 1, 1>, scalar_prefetch = 0 : i64, scratch_operands = 2 : i64, tpu.core_type = #tpu.core_type<tc>, window_params = [{transform_indices = @transform_0, window_bounds = array<i64: 8, 8, 512>}, {pipeline_mode = #tpu.pipeline_mode<synchronous>, transform_indices = @transform_1, window_bounds = array<i64: 128, 512>}, {pipeline_mode = #tpu.pipeline_mode<synchronous>, transform_indices = @transform_2, window_bounds = array<i64: 128, 128>}, {pipeline_mode = #tpu.pipeline_mode<synchronous>, transform_indices = @transform_3, window_bounds = array<i64: 1, 128>}, {transform_indices = @transform_4, window_bounds = array<i64: 8, 128>}]} {
    %c0_i32 = arith.constant 0 : i32
    %0 = arith.cmpi eq, %arg1, %c0_i32 : i32
    %1 = arith.extui %0 : i1 to i32
    %c0_i32_0 = arith.constant 0 : i32
    %2 = arith.cmpi ne, %1, %c0_i32_0 : i32
    scf.if %2 {
      %cst_108 = arith.constant 0.000000e+00 : f32
      %307 = vector.broadcast %cst_108 : f32 to vector<8x128xf32>
      %c0_109 = arith.constant 0 : index
      %c0_110 = arith.constant 0 : index
      %308 = vector.load %arg7[%c0_109, %c0_110] : memref<8x128xf32, #tpu.memory_space<vmem>>, vector<8x128xf32>
      tpu.vector_store %arg7[%c0_109, %c0_110], %307 {strides = array<i32>} : memref<8x128xf32, #tpu.memory_space<vmem>>, vector<8x128xf32>,
      %cst_111 = arith.constant 0.000000e+00 : f32
      %309 = vector.broadcast %cst_111 : f32 to vector<8x128xf32>
      %c0_112 = arith.constant 0 : index
      %c0_113 = arith.constant 0 : index
      %310 = vector.load %arg8[%c0_112, %c0_113] : memref<8x128xf32, #tpu.memory_space<vmem>>, vector<8x128xf32>
      tpu.vector_store %arg8[%c0_112, %c0_113], %309 {strides = array<i32>} : memref<8x128xf32, #tpu.memory_space<vmem>>, vector<8x128xf32>,
    } else {
    }
    %c0 = arith.constant 0 : index
    %c0_1 = arith.constant 0 : index
    %3 = vector.load %arg3[%c0, %c0_1] : memref<128x512xbf16, #tpu.memory_space<vmem>>, vector<128x512xbf16>
    %c0_2 = arith.constant 0 : index
    %c0_3 = arith.constant 0 : index
    %4 = vector.load %arg7[%c0_2, %c0_3] : memref<8x128xf32, #tpu.memory_space<vmem>>, vector<8x128xf32>
    %c0_4 = arith.constant 0 : index
    %c0_5 = arith.constant 0 : index
    %5 = vector.load %arg8[%c0_4, %c0_5] : memref<8x128xf32, #tpu.memory_space<vmem>>, vector<8x128xf32>
    %c0_i32_6 = arith.constant 0 : i32
    %6 = arith.index_cast %c0_i32_6 : i32 to index
    %c0_7 = arith.constant 0 : index
    %c0_8 = arith.constant 0 : index
    %7 = vector.load %arg2[%6, %c0_7, %c0_8] : memref<8x8x512xf32, #tpu.memory_space<vmem>>, vector<1x8x512xf32>
    %8 = vector.shape_cast %7 : vector<1x8x512xf32> to vector<8x512xf32>
    %9 = arith.truncf %4 : vector<8x128xf32> to vector<8x128xbf16>
    %cst = arith.constant dense<0.000000e+00> : vector<8x512xf32>
    %10 = tpu.matmul %9, %3, %cst {dimension_numbers = #tpu.dot_dimension_numbers<[1], [0], [0], [1], [0, 0, 1, 1], [], []>} : vector<8x128xbf16>, vector<128x512xbf16>, vector<8x512xf32> -> vector<8x512xf32>
    %11 = arith.addf %8, %10 : vector<8x512xf32>
    %12 = vector.extract_strided_slice %11 {offsets = [0, 0], sizes = [8, 128], strides = [1, 1]} : vector<8x512xf32> to vector<8x128xf32>
    %cst_9 = arith.constant 5.000000e-01 : f32
    %13 = vector.broadcast %cst_9 : f32 to vector<8x128xf32>
    %14 = arith.mulf %13, %12 : vector<8x128xf32>
    %15 = math.tanh %14 : vector<8x128xf32>
    %cst_10 = arith.constant 5.000000e-01 : f32
    %16 = vector.broadcast %cst_10 : f32 to vector<8x128xf32>
    %17 = arith.mulf %16, %15 : vector<8x128xf32>
    %cst_11 = arith.constant 5.000000e-01 : f32
    %18 = vector.broadcast %cst_11 : f32 to vector<8x128xf32>
    %19 = arith.addf %17, %18 : vector<8x128xf32>
    %20 = vector.extract_strided_slice %11 {offsets = [0, 128], sizes = [8, 128], strides = [1, 1]} : vector<8x512xf32> to vector<8x128xf32>
    %cst_12 = arith.constant 5.000000e-01 : f32
    %21 = vector.broadcast %cst_12 : f32 to vector<8x128xf32>
    %22 = arith.mulf %21, %20 : vector<8x128xf32>
    %23 = math.tanh %22 : vector<8x128xf32>
    %cst_13 = arith.constant 5.000000e-01 : f32
    %24 = vector.broadcast %cst_13 : f32 to vector<8x128xf32>
    %25 = arith.mulf %24, %23 : vector<8x128xf32>
    %cst_14 = arith.constant 5.000000e-01 : f32
    %26 = vector.broadcast %cst_14 : f32 to vector<8x128xf32>
    %27 = arith.addf %25, %26 : vector<8x128xf32>
    %28 = vector.extract_strided_slice %11 {offsets = [0, 256], sizes = [8, 128], strides = [1, 1]} : vector<8x512xf32> to vector<8x128xf32>
    %29 = math.tanh %28 : vector<8x128xf32>
    %30 = vector.extract_strided_slice %11 {offsets = [0, 384], sizes = [8, 128], strides = [1, 1]} : vector<8x512xf32> to vector<8x128xf32>
    %cst_15 = arith.constant 5.000000e-01 : f32
    %31 = vector.broadcast %cst_15 : f32 to vector<8x128xf32>
    %32 = arith.mulf %31, %30 : vector<8x128xf32>
    %33 = math.tanh %32 : vector<8x128xf32>
    %cst_16 = arith.constant 5.000000e-01 : f32
    %34 = vector.broadcast %cst_16 : f32 to vector<8x128xf32>
    %35 = arith.mulf %34, %33 : vector<8x128xf32>
    %cst_17 = arith.constant 5.000000e-01 : f32
    %36 = vector.broadcast %cst_17 : f32 to vector<8x128xf32>
    %37 = arith.addf %35, %36 : vector<8x128xf32>
    %38 = arith.mulf %27, %5 : vector<8x128xf32>
    %39 = arith.mulf %19, %29 : vector<8x128xf32>
    %40 = arith.addf %38, %39 : vector<8x128xf32>
    %41 = math.tanh %40 : vector<8x128xf32>
    %42 = arith.mulf %37, %41 : vector<8x128xf32>
    %c1_i32 = arith.constant 1 : i32
    %43 = arith.index_cast %c1_i32 : i32 to index
    %c0_18 = arith.constant 0 : index
    %c0_19 = arith.constant 0 : index
    %44 = vector.load %arg2[%43, %c0_18, %c0_19] : memref<8x8x512xf32, #tpu.memory_space<vmem>>, vector<1x8x512xf32>
    %45 = vector.shape_cast %44 : vector<1x8x512xf32> to vector<8x512xf32>
    %46 = arith.truncf %42 : vector<8x128xf32> to vector<8x128xbf16>
    %cst_20 = arith.constant dense<0.000000e+00> : vector<8x512xf32>
    %47 = tpu.matmul %46, %3, %cst_20 {dimension_numbers = #tpu.dot_dimension_numbers<[1], [0], [0], [1], [0, 0, 1, 1], [], []>} : vector<8x128xbf16>, vector<128x512xbf16>, vector<8x512xf32> -> vector<8x512xf32>
    %48 = arith.addf %45, %47 : vector<8x512xf32>
    %49 = vector.extract_strided_slice %48 {offsets = [0, 0], sizes = [8, 128], strides = [1, 1]} : vector<8x512xf32> to vector<8x128xf32>
    %cst_21 = arith.constant 5.000000e-01 : f32
    %50 = vector.broadcast %cst_21 : f32 to vector<8x128xf32>
    %51 = arith.mulf %50, %49 : vector<8x128xf32>
    %52 = math.tanh %51 : vector<8x128xf32>
    %cst_22 = arith.constant 5.000000e-01 : f32
    %53 = vector.broadcast %cst_22 : f32 to vector<8x128xf32>
    %54 = arith.mulf %53, %52 : vector<8x128xf32>
    %cst_23 = arith.constant 5.000000e-01 : f32
    %55 = vector.broadcast %cst_23 : f32 to vector<8x128xf32>
    %56 = arith.addf %54, %55 : vector<8x128xf32>
    %57 = vector.extract_strided_slice %48 {offsets = [0, 128], sizes = [8, 128], strides = [1, 1]} : vector<8x512xf32> to vector<8x128xf32>
    %cst_24 = arith.constant 5.000000e-01 : f32
    %58 = vector.broadcast %cst_24 : f32 to vector<8x128xf32>
    %59 = arith.mulf %58, %57 : vector<8x128xf32>
    %60 = math.tanh %59 : vector<8x128xf32>
    %cst_25 = arith.constant 5.000000e-01 : f32
    %61 = vector.broadcast %cst_25 : f32 to vector<8x128xf32>
    %62 = arith.mulf %61, %60 : vector<8x128xf32>
    %cst_26 = arith.constant 5.000000e-01 : f32
    %63 = vector.broadcast %cst_26 : f32 to vector<8x128xf32>
    %64 = arith.addf %62, %63 : vector<8x128xf32>
    %65 = vector.extract_strided_slice %48 {offsets = [0, 256], sizes = [8, 128], strides = [1, 1]} : vector<8x512xf32> to vector<8x128xf32>
    %66 = math.tanh %65 : vector<8x128xf32>
    %67 = vector.extract_strided_slice %48 {offsets = [0, 384], sizes = [8, 128], strides = [1, 1]} : vector<8x512xf32> to vector<8x128xf32>
    %cst_27 = arith.constant 5.000000e-01 : f32
    %68 = vector.broadcast %cst_27 : f32 to vector<8x128xf32>
    %69 = arith.mulf %68, %67 : vector<8x128xf32>
    %70 = math.tanh %69 : vector<8x128xf32>
    %cst_28 = arith.constant 5.000000e-01 : f32
    %71 = vector.broadcast %cst_28 : f32 to vector<8x128xf32>
    %72 = arith.mulf %71, %70 : vector<8x128xf32>
    %cst_29 = arith.constant 5.000000e-01 : f32
    %73 = vector.broadcast %cst_29 : f32 to vector<8x128xf32>
    %74 = arith.addf %72, %73 : vector<8x128xf32>
    %75 = arith.mulf %64, %40 : vector<8x128xf32>
    %76 = arith.mulf %56, %66 : vector<8x128xf32>
    %77 = arith.addf %75, %76 : vector<8x128xf32>
    %78 = math.tanh %77 : vector<8x128xf32>
    %79 = arith.mulf %74, %78 : vector<8x128xf32>
    %c2_i32 = arith.constant 2 : i32
    %80 = arith.index_cast %c2_i32 : i32 to index
    %c0_30 = arith.constant 0 : index
    %c0_31 = arith.constant 0 : index
    %81 = vector.load %arg2[%80, %c0_30, %c0_31] : memref<8x8x512xf32, #tpu.memory_space<vmem>>, vector<1x8x512xf32>
    %82 = vector.shape_cast %81 : vector<1x8x512xf32> to vector<8x512xf32>
    %83 = arith.truncf %79 : vector<8x128xf32> to vector<8x128xbf16>
    %cst_32 = arith.constant dense<0.000000e+00> : vector<8x512xf32>
    %84 = tpu.matmul %83, %3, %cst_32 {dimension_numbers = #tpu.dot_dimension_numbers<[1], [0], [0], [1], [0, 0, 1, 1], [], []>} : vector<8x128xbf16>, vector<128x512xbf16>, vector<8x512xf32> -> vector<8x512xf32>
    %85 = arith.addf %82, %84 : vector<8x512xf32>
    %86 = vector.extract_strided_slice %85 {offsets = [0, 0], sizes = [8, 128], strides = [1, 1]} : vector<8x512xf32> to vector<8x128xf32>
    %cst_33 = arith.constant 5.000000e-01 : f32
    %87 = vector.broadcast %cst_33 : f32 to vector<8x128xf32>
    %88 = arith.mulf %87, %86 : vector<8x128xf32>
    %89 = math.tanh %88 : vector<8x128xf32>
    %cst_34 = arith.constant 5.000000e-01 : f32
    %90 = vector.broadcast %cst_34 : f32 to vector<8x128xf32>
    %91 = arith.mulf %90, %89 : vector<8x128xf32>
    %cst_35 = arith.constant 5.000000e-01 : f32
    %92 = vector.broadcast %cst_35 : f32 to vector<8x128xf32>
    %93 = arith.addf %91, %92 : vector<8x128xf32>
    %94 = vector.extract_strided_slice %85 {offsets = [0, 128], sizes = [8, 128], strides = [1, 1]} : vector<8x512xf32> to vector<8x128xf32>
    %cst_36 = arith.constant 5.000000e-01 : f32
    %95 = vector.broadcast %cst_36 : f32 to vector<8x128xf32>
    %96 = arith.mulf %95, %94 : vector<8x128xf32>
    %97 = math.tanh %96 : vector<8x128xf32>
    %cst_37 = arith.constant 5.000000e-01 : f32
    %98 = vector.broadcast %cst_37 : f32 to vector<8x128xf32>
    %99 = arith.mulf %98, %97 : vector<8x128xf32>
    %cst_38 = arith.constant 5.000000e-01 : f32
    %100 = vector.broadcast %cst_38 : f32 to vector<8x128xf32>
    %101 = arith.addf %99, %100 : vector<8x128xf32>
    %102 = vector.extract_strided_slice %85 {offsets = [0, 256], sizes = [8, 128], strides = [1, 1]} : vector<8x512xf32> to vector<8x128xf32>
    %103 = math.tanh %102 : vector<8x128xf32>
    %104 = vector.extract_strided_slice %85 {offsets = [0, 384], sizes = [8, 128], strides = [1, 1]} : vector<8x512xf32> to vector<8x128xf32>
    %cst_39 = arith.constant 5.000000e-01 : f32
    %105 = vector.broadcast %cst_39 : f32 to vector<8x128xf32>
    %106 = arith.mulf %105, %104 : vector<8x128xf32>
    %107 = math.tanh %106 : vector<8x128xf32>
    %cst_40 = arith.constant 5.000000e-01 : f32
    %108 = vector.broadcast %cst_40 : f32 to vector<8x128xf32>
    %109 = arith.mulf %108, %107 : vector<8x128xf32>
    %cst_41 = arith.constant 5.000000e-01 : f32
    %110 = vector.broadcast %cst_41 : f32 to vector<8x128xf32>
    %111 = arith.addf %109, %110 : vector<8x128xf32>
    %112 = arith.mulf %101, %77 : vector<8x128xf32>
    %113 = arith.mulf %93, %103 : vector<8x128xf32>
    %114 = arith.addf %112, %113 : vector<8x128xf32>
    %115 = math.tanh %114 : vector<8x128xf32>
    %116 = arith.mulf %111, %115 : vector<8x128xf32>
    %c3_i32 = arith.constant 3 : i32
    %117 = arith.index_cast %c3_i32 : i32 to index
    %c0_42 = arith.constant 0 : index
    %c0_43 = arith.constant 0 : index
    %118 = vector.load %arg2[%117, %c0_42, %c0_43] : memref<8x8x512xf32, #tpu.memory_space<vmem>>, vector<1x8x512xf32>
    %119 = vector.shape_cast %118 : vector<1x8x512xf32> to vector<8x512xf32>
    %120 = arith.truncf %116 : vector<8x128xf32> to vector<8x128xbf16>
    %cst_44 = arith.constant dense<0.000000e+00> : vector<8x512xf32>
    %121 = tpu.matmul %120, %3, %cst_44 {dimension_numbers = #tpu.dot_dimension_numbers<[1], [0], [0], [1], [0, 0, 1, 1], [], []>} : vector<8x128xbf16>, vector<128x512xbf16>, vector<8x512xf32> -> vector<8x512xf32>
    %122 = arith.addf %119, %121 : vector<8x512xf32>
    %123 = vector.extract_strided_slice %122 {offsets = [0, 0], sizes = [8, 128], strides = [1, 1]} : vector<8x512xf32> to vector<8x128xf32>
    %cst_45 = arith.constant 5.000000e-01 : f32
    %124 = vector.broadcast %cst_45 : f32 to vector<8x128xf32>
    %125 = arith.mulf %124, %123 : vector<8x128xf32>
    %126 = math.tanh %125 : vector<8x128xf32>
    %cst_46 = arith.constant 5.000000e-01 : f32
    %127 = vector.broadcast %cst_46 : f32 to vector<8x128xf32>
    %128 = arith.mulf %127, %126 : vector<8x128xf32>
    %cst_47 = arith.constant 5.000000e-01 : f32
    %129 = vector.broadcast %cst_47 : f32 to vector<8x128xf32>
    %130 = arith.addf %128, %129 : vector<8x128xf32>
    %131 = vector.extract_strided_slice %122 {offsets = [0, 128], sizes = [8, 128], strides = [1, 1]} : vector<8x512xf32> to vector<8x128xf32>
    %cst_48 = arith.constant 5.000000e-01 : f32
    %132 = vector.broadcast %cst_48 : f32 to vector<8x128xf32>
    %133 = arith.mulf %132, %131 : vector<8x128xf32>
    %134 = math.tanh %133 : vector<8x128xf32>
    %cst_49 = arith.constant 5.000000e-01 : f32
    %135 = vector.broadcast %cst_49 : f32 to vector<8x128xf32>
    %136 = arith.mulf %135, %134 : vector<8x128xf32>
    %cst_50 = arith.constant 5.000000e-01 : f32
    %137 = vector.broadcast %cst_50 : f32 to vector<8x128xf32>
    %138 = arith.addf %136, %137 : vector<8x128xf32>
    %139 = vector.extract_strided_slice %122 {offsets = [0, 256], sizes = [8, 128], strides = [1, 1]} : vector<8x512xf32> to vector<8x128xf32>
    %140 = math.tanh %139 : vector<8x128xf32>
    %141 = vector.extract_strided_slice %122 {offsets = [0, 384], sizes = [8, 128], strides = [1, 1]} : vector<8x512xf32> to vector<8x128xf32>
    %cst_51 = arith.constant 5.000000e-01 : f32
    %142 = vector.broadcast %cst_51 : f32 to vector<8x128xf32>
    %143 = arith.mulf %142, %141 : vector<8x128xf32>
    %144 = math.tanh %143 : vector<8x128xf32>
    %cst_52 = arith.constant 5.000000e-01 : f32
    %145 = vector.broadcast %cst_52 : f32 to vector<8x128xf32>
    %146 = arith.mulf %145, %144 : vector<8x128xf32>
    %cst_53 = arith.constant 5.000000e-01 : f32
    %147 = vector.broadcast %cst_53 : f32 to vector<8x128xf32>
    %148 = arith.addf %146, %147 : vector<8x128xf32>
    %149 = arith.mulf %138, %114 : vector<8x128xf32>
    %150 = arith.mulf %130, %140 : vector<8x128xf32>
    %151 = arith.addf %149, %150 : vector<8x128xf32>
    %152 = math.tanh %151 : vector<8x128xf32>
    %153 = arith.mulf %148, %152 : vector<8x128xf32>
    %c4_i32 = arith.constant 4 : i32
    %154 = arith.index_cast %c4_i32 : i32 to index
    %c0_54 = arith.constant 0 : index
    %c0_55 = arith.constant 0 : index
    %155 = vector.load %arg2[%154, %c0_54, %c0_55] : memref<8x8x512xf32, #tpu.memory_space<vmem>>, vector<1x8x512xf32>
    %156 = vector.shape_cast %155 : vector<1x8x512xf32> to vector<8x512xf32>
    %157 = arith.truncf %153 : vector<8x128xf32> to vector<8x128xbf16>
    %cst_56 = arith.constant dense<0.000000e+00> : vector<8x512xf32>
    %158 = tpu.matmul %157, %3, %cst_56 {dimension_numbers = #tpu.dot_dimension_numbers<[1], [0], [0], [1], [0, 0, 1, 1], [], []>} : vector<8x128xbf16>, vector<128x512xbf16>, vector<8x512xf32> -> vector<8x512xf32>
    %159 = arith.addf %156, %158 : vector<8x512xf32>
    %160 = vector.extract_strided_slice %159 {offsets = [0, 0], sizes = [8, 128], strides = [1, 1]} : vector<8x512xf32> to vector<8x128xf32>
    %cst_57 = arith.constant 5.000000e-01 : f32
    %161 = vector.broadcast %cst_57 : f32 to vector<8x128xf32>
    %162 = arith.mulf %161, %160 : vector<8x128xf32>
    %163 = math.tanh %162 : vector<8x128xf32>
    %cst_58 = arith.constant 5.000000e-01 : f32
    %164 = vector.broadcast %cst_58 : f32 to vector<8x128xf32>
    %165 = arith.mulf %164, %163 : vector<8x128xf32>
    %cst_59 = arith.constant 5.000000e-01 : f32
    %166 = vector.broadcast %cst_59 : f32 to vector<8x128xf32>
    %167 = arith.addf %165, %166 : vector<8x128xf32>
    %168 = vector.extract_strided_slice %159 {offsets = [0, 128], sizes = [8, 128], strides = [1, 1]} : vector<8x512xf32> to vector<8x128xf32>
    %cst_60 = arith.constant 5.000000e-01 : f32
    %169 = vector.broadcast %cst_60 : f32 to vector<8x128xf32>
    %170 = arith.mulf %169, %168 : vector<8x128xf32>
    %171 = math.tanh %170 : vector<8x128xf32>
    %cst_61 = arith.constant 5.000000e-01 : f32
    %172 = vector.broadcast %cst_61 : f32 to vector<8x128xf32>
    %173 = arith.mulf %172, %171 : vector<8x128xf32>
    %cst_62 = arith.constant 5.000000e-01 : f32
    %174 = vector.broadcast %cst_62 : f32 to vector<8x128xf32>
    %175 = arith.addf %173, %174 : vector<8x128xf32>
    %176 = vector.extract_strided_slice %159 {offsets = [0, 256], sizes = [8, 128], strides = [1, 1]} : vector<8x512xf32> to vector<8x128xf32>
    %177 = math.tanh %176 : vector<8x128xf32>
    %178 = vector.extract_strided_slice %159 {offsets = [0, 384], sizes = [8, 128], strides = [1, 1]} : vector<8x512xf32> to vector<8x128xf32>
    %cst_63 = arith.constant 5.000000e-01 : f32
    %179 = vector.broadcast %cst_63 : f32 to vector<8x128xf32>
    %180 = arith.mulf %179, %178 : vector<8x128xf32>
    %181 = math.tanh %180 : vector<8x128xf32>
    %cst_64 = arith.constant 5.000000e-01 : f32
    %182 = vector.broadcast %cst_64 : f32 to vector<8x128xf32>
    %183 = arith.mulf %182, %181 : vector<8x128xf32>
    %cst_65 = arith.constant 5.000000e-01 : f32
    %184 = vector.broadcast %cst_65 : f32 to vector<8x128xf32>
    %185 = arith.addf %183, %184 : vector<8x128xf32>
    %186 = arith.mulf %175, %151 : vector<8x128xf32>
    %187 = arith.mulf %167, %177 : vector<8x128xf32>
    %188 = arith.addf %186, %187 : vector<8x128xf32>
    %189 = math.tanh %188 : vector<8x128xf32>
    %190 = arith.mulf %185, %189 : vector<8x128xf32>
    %c5_i32 = arith.constant 5 : i32
    %191 = arith.index_cast %c5_i32 : i32 to index
    %c0_66 = arith.constant 0 : index
    %c0_67 = arith.constant 0 : index
    %192 = vector.load %arg2[%191, %c0_66, %c0_67] : memref<8x8x512xf32, #tpu.memory_space<vmem>>, vector<1x8x512xf32>
    %193 = vector.shape_cast %192 : vector<1x8x512xf32> to vector<8x512xf32>
    %194 = arith.truncf %190 : vector<8x128xf32> to vector<8x128xbf16>
    %cst_68 = arith.constant dense<0.000000e+00> : vector<8x512xf32>
    %195 = tpu.matmul %194, %3, %cst_68 {dimension_numbers = #tpu.dot_dimension_numbers<[1], [0], [0], [1], [0, 0, 1, 1], [], []>} : vector<8x128xbf16>, vector<128x512xbf16>, vector<8x512xf32> -> vector<8x512xf32>
    %196 = arith.addf %193, %195 : vector<8x512xf32>
    %197 = vector.extract_strided_slice %196 {offsets = [0, 0], sizes = [8, 128], strides = [1, 1]} : vector<8x512xf32> to vector<8x128xf32>
    %cst_69 = arith.constant 5.000000e-01 : f32
    %198 = vector.broadcast %cst_69 : f32 to vector<8x128xf32>
    %199 = arith.mulf %198, %197 : vector<8x128xf32>
    %200 = math.tanh %199 : vector<8x128xf32>
    %cst_70 = arith.constant 5.000000e-01 : f32
    %201 = vector.broadcast %cst_70 : f32 to vector<8x128xf32>
    %202 = arith.mulf %201, %200 : vector<8x128xf32>
    %cst_71 = arith.constant 5.000000e-01 : f32
    %203 = vector.broadcast %cst_71 : f32 to vector<8x128xf32>
    %204 = arith.addf %202, %203 : vector<8x128xf32>
    %205 = vector.extract_strided_slice %196 {offsets = [0, 128], sizes = [8, 128], strides = [1, 1]} : vector<8x512xf32> to vector<8x128xf32>
    %cst_72 = arith.constant 5.000000e-01 : f32
    %206 = vector.broadcast %cst_72 : f32 to vector<8x128xf32>
    %207 = arith.mulf %206, %205 : vector<8x128xf32>
    %208 = math.tanh %207 : vector<8x128xf32>
    %cst_73 = arith.constant 5.000000e-01 : f32
    %209 = vector.broadcast %cst_73 : f32 to vector<8x128xf32>
    %210 = arith.mulf %209, %208 : vector<8x128xf32>
    %cst_74 = arith.constant 5.000000e-01 : f32
    %211 = vector.broadcast %cst_74 : f32 to vector<8x128xf32>
    %212 = arith.addf %210, %211 : vector<8x128xf32>
    %213 = vector.extract_strided_slice %196 {offsets = [0, 256], sizes = [8, 128], strides = [1, 1]} : vector<8x512xf32> to vector<8x128xf32>
    %214 = math.tanh %213 : vector<8x128xf32>
    %215 = vector.extract_strided_slice %196 {offsets = [0, 384], sizes = [8, 128], strides = [1, 1]} : vector<8x512xf32> to vector<8x128xf32>
    %cst_75 = arith.constant 5.000000e-01 : f32
    %216 = vector.broadcast %cst_75 : f32 to vector<8x128xf32>
    %217 = arith.mulf %216, %215 : vector<8x128xf32>
    %218 = math.tanh %217 : vector<8x128xf32>
    %cst_76 = arith.constant 5.000000e-01 : f32
    %219 = vector.broadcast %cst_76 : f32 to vector<8x128xf32>
    %220 = arith.mulf %219, %218 : vector<8x128xf32>
    %cst_77 = arith.constant 5.000000e-01 : f32
    %221 = vector.broadcast %cst_77 : f32 to vector<8x128xf32>
    %222 = arith.addf %220, %221 : vector<8x128xf32>
    %223 = arith.mulf %212, %188 : vector<8x128xf32>
    %224 = arith.mulf %204, %214 : vector<8x128xf32>
    %225 = arith.addf %223, %224 : vector<8x128xf32>
    %226 = math.tanh %225 : vector<8x128xf32>
    %227 = arith.mulf %222, %226 : vector<8x128xf32>
    %c6_i32 = arith.constant 6 : i32
    %228 = arith.index_cast %c6_i32 : i32 to index
    %c0_78 = arith.constant 0 : index
    %c0_79 = arith.constant 0 : index
    %229 = vector.load %arg2[%228, %c0_78, %c0_79] : memref<8x8x512xf32, #tpu.memory_space<vmem>>, vector<1x8x512xf32>
    %230 = vector.shape_cast %229 : vector<1x8x512xf32> to vector<8x512xf32>
    %231 = arith.truncf %227 : vector<8x128xf32> to vector<8x128xbf16>
    %cst_80 = arith.constant dense<0.000000e+00> : vector<8x512xf32>
    %232 = tpu.matmul %231, %3, %cst_80 {dimension_numbers = #tpu.dot_dimension_numbers<[1], [0], [0], [1], [0, 0, 1, 1], [], []>} : vector<8x128xbf16>, vector<128x512xbf16>, vector<8x512xf32> -> vector<8x512xf32>
    %233 = arith.addf %230, %232 : vector<8x512xf32>
    %234 = vector.extract_strided_slice %233 {offsets = [0, 0], sizes = [8, 128], strides = [1, 1]} : vector<8x512xf32> to vector<8x128xf32>
    %cst_81 = arith.constant 5.000000e-01 : f32
    %235 = vector.broadcast %cst_81 : f32 to vector<8x128xf32>
    %236 = arith.mulf %235, %234 : vector<8x128xf32>
    %237 = math.tanh %236 : vector<8x128xf32>
    %cst_82 = arith.constant 5.000000e-01 : f32
    %238 = vector.broadcast %cst_82 : f32 to vector<8x128xf32>
    %239 = arith.mulf %238, %237 : vector<8x128xf32>
    %cst_83 = arith.constant 5.000000e-01 : f32
    %240 = vector.broadcast %cst_83 : f32 to vector<8x128xf32>
    %241 = arith.addf %239, %240 : vector<8x128xf32>
    %242 = vector.extract_strided_slice %233 {offsets = [0, 128], sizes = [8, 128], strides = [1, 1]} : vector<8x512xf32> to vector<8x128xf32>
    %cst_84 = arith.constant 5.000000e-01 : f32
    %243 = vector.broadcast %cst_84 : f32 to vector<8x128xf32>
    %244 = arith.mulf %243, %242 : vector<8x128xf32>
    %245 = math.tanh %244 : vector<8x128xf32>
    %cst_85 = arith.constant 5.000000e-01 : f32
    %246 = vector.broadcast %cst_85 : f32 to vector<8x128xf32>
    %247 = arith.mulf %246, %245 : vector<8x128xf32>
    %cst_86 = arith.constant 5.000000e-01 : f32
    %248 = vector.broadcast %cst_86 : f32 to vector<8x128xf32>
    %249 = arith.addf %247, %248 : vector<8x128xf32>
    %250 = vector.extract_strided_slice %233 {offsets = [0, 256], sizes = [8, 128], strides = [1, 1]} : vector<8x512xf32> to vector<8x128xf32>
    %251 = math.tanh %250 : vector<8x128xf32>
    %252 = vector.extract_strided_slice %233 {offsets = [0, 384], sizes = [8, 128], strides = [1, 1]} : vector<8x512xf32> to vector<8x128xf32>
    %cst_87 = arith.constant 5.000000e-01 : f32
    %253 = vector.broadcast %cst_87 : f32 to vector<8x128xf32>
    %254 = arith.mulf %253, %252 : vector<8x128xf32>
    %255 = math.tanh %254 : vector<8x128xf32>
    %cst_88 = arith.constant 5.000000e-01 : f32
    %256 = vector.broadcast %cst_88 : f32 to vector<8x128xf32>
    %257 = arith.mulf %256, %255 : vector<8x128xf32>
    %cst_89 = arith.constant 5.000000e-01 : f32
    %258 = vector.broadcast %cst_89 : f32 to vector<8x128xf32>
    %259 = arith.addf %257, %258 : vector<8x128xf32>
    %260 = arith.mulf %249, %225 : vector<8x128xf32>
    %261 = arith.mulf %241, %251 : vector<8x128xf32>
    %262 = arith.addf %260, %261 : vector<8x128xf32>
    %263 = math.tanh %262 : vector<8x128xf32>
    %264 = arith.mulf %259, %263 : vector<8x128xf32>
    %c7_i32 = arith.constant 7 : i32
    %265 = arith.index_cast %c7_i32 : i32 to index
    %c0_90 = arith.constant 0 : index
    %c0_91 = arith.constant 0 : index
    %266 = vector.load %arg2[%265, %c0_90, %c0_91] : memref<8x8x512xf32, #tpu.memory_space<vmem>>, vector<1x8x512xf32>
    %267 = vector.shape_cast %266 : vector<1x8x512xf32> to vector<8x512xf32>
    %268 = arith.truncf %264 : vector<8x128xf32> to vector<8x128xbf16>
    %cst_92 = arith.constant dense<0.000000e+00> : vector<8x512xf32>
    %269 = tpu.matmul %268, %3, %cst_92 {dimension_numbers = #tpu.dot_dimension_numbers<[1], [0], [0], [1], [0, 0, 1, 1], [], []>} : vector<8x128xbf16>, vector<128x512xbf16>, vector<8x512xf32> -> vector<8x512xf32>
    %270 = arith.addf %267, %269 : vector<8x512xf32>
    %271 = vector.extract_strided_slice %270 {offsets = [0, 0], sizes = [8, 128], strides = [1, 1]} : vector<8x512xf32> to vector<8x128xf32>
    %cst_93 = arith.constant 5.000000e-01 : f32
    %272 = vector.broadcast %cst_93 : f32 to vector<8x128xf32>
    %273 = arith.mulf %272, %271 : vector<8x128xf32>
    %274 = math.tanh %273 : vector<8x128xf32>
    %cst_94 = arith.constant 5.000000e-01 : f32
    %275 = vector.broadcast %cst_94 : f32 to vector<8x128xf32>
    %276 = arith.mulf %275, %274 : vector<8x128xf32>
    %cst_95 = arith.constant 5.000000e-01 : f32
    %277 = vector.broadcast %cst_95 : f32 to vector<8x128xf32>
    %278 = arith.addf %276, %277 : vector<8x128xf32>
    %279 = vector.extract_strided_slice %270 {offsets = [0, 128], sizes = [8, 128], strides = [1, 1]} : vector<8x512xf32> to vector<8x128xf32>
    %cst_96 = arith.constant 5.000000e-01 : f32
    %280 = vector.broadcast %cst_96 : f32 to vector<8x128xf32>
    %281 = arith.mulf %280, %279 : vector<8x128xf32>
    %282 = math.tanh %281 : vector<8x128xf32>
    %cst_97 = arith.constant 5.000000e-01 : f32
    %283 = vector.broadcast %cst_97 : f32 to vector<8x128xf32>
    %284 = arith.mulf %283, %282 : vector<8x128xf32>
    %cst_98 = arith.constant 5.000000e-01 : f32
    %285 = vector.broadcast %cst_98 : f32 to vector<8x128xf32>
    %286 = arith.addf %284, %285 : vector<8x128xf32>
    %287 = vector.extract_strided_slice %270 {offsets = [0, 256], sizes = [8, 128], strides = [1, 1]} : vector<8x512xf32> to vector<8x128xf32>
    %288 = math.tanh %287 : vector<8x128xf32>
    %289 = vector.extract_strided_slice %270 {offsets = [0, 384], sizes = [8, 128], strides = [1, 1]} : vector<8x512xf32> to vector<8x128xf32>
    %cst_99 = arith.constant 5.000000e-01 : f32
    %290 = vector.broadcast %cst_99 : f32 to vector<8x128xf32>
    %291 = arith.mulf %290, %289 : vector<8x128xf32>
    %292 = math.tanh %291 : vector<8x128xf32>
    %cst_100 = arith.constant 5.000000e-01 : f32
    %293 = vector.broadcast %cst_100 : f32 to vector<8x128xf32>
    %294 = arith.mulf %293, %292 : vector<8x128xf32>
    %cst_101 = arith.constant 5.000000e-01 : f32
    %295 = vector.broadcast %cst_101 : f32 to vector<8x128xf32>
    %296 = arith.addf %294, %295 : vector<8x128xf32>
    %297 = arith.mulf %286, %262 : vector<8x128xf32>
    %298 = arith.mulf %278, %288 : vector<8x128xf32>
    %299 = arith.addf %297, %298 : vector<8x128xf32>
    %300 = math.tanh %299 : vector<8x128xf32>
    %301 = arith.mulf %296, %300 : vector<8x128xf32>
    %c8_i32 = arith.constant 8 : i32
    %c0_102 = arith.constant 0 : index
    %c0_103 = arith.constant 0 : index
    %302 = vector.load %arg7[%c0_102, %c0_103] : memref<8x128xf32, #tpu.memory_space<vmem>>, vector<8x128xf32>
    tpu.vector_store %arg7[%c0_102, %c0_103], %301 {strides = array<i32>} : memref<8x128xf32, #tpu.memory_space<vmem>>, vector<8x128xf32>,
    %c0_104 = arith.constant 0 : index
    %c0_105 = arith.constant 0 : index
    %303 = vector.load %arg8[%c0_104, %c0_105] : memref<8x128xf32, #tpu.memory_space<vmem>>, vector<8x128xf32>
    tpu.vector_store %arg8[%c0_104, %c0_105], %299 {strides = array<i32>} : memref<8x128xf32, #tpu.memory_space<vmem>>, vector<8x128xf32>,
    %c0_i32_106 = arith.constant 0 : i32
    %304 = arith.cmpi eq, %arg1, %c0_i32_106 : i32
    %305 = arith.extui %304 : i1 to i32
    %c0_i32_107 = arith.constant 0 : i32
    %306 = arith.cmpi ne, %305, %c0_i32_107 : i32
    scf.if %306 {
      %307 = arith.truncf %301 : vector<8x128xf32> to vector<8x128xbf16>
      %c0_108 = arith.constant 0 : index
      %c0_109 = arith.constant 0 : index
      %308 = vector.load %arg4[%c0_108, %c0_109] : memref<128x128xbf16, #tpu.memory_space<vmem>>, vector<128x128xbf16>
      %cst_110 = arith.constant dense<0.000000e+00> : vector<8x128xf32>
      %309 = tpu.matmul %307, %308, %cst_110 {dimension_numbers = #tpu.dot_dimension_numbers<[1], [0], [0], [1], [0, 0, 1, 1], [], []>} : vector<8x128xbf16>, vector<128x128xbf16>, vector<8x128xf32> -> vector<8x128xf32>
      %c0_111 = arith.constant 0 : index
      %c0_112 = arith.constant 0 : index
      %310 = vector.load %arg5[%c0_111, %c0_112] : memref<1x128xf32, #tpu.memory_space<vmem>>, vector<1x128xf32>
      %311 = vector.broadcast %310 : vector<1x128xf32> to vector<8x128xf32>
      %312 = arith.addf %309, %311 : vector<8x128xf32>
      %c0_113 = arith.constant 0 : index
      %c0_114 = arith.constant 0 : index
      %313 = vector.load %arg6[%c0_113, %c0_114] : memref<8x128xf32, #tpu.memory_space<vmem>>, vector<8x128xf32>
      tpu.vector_store %arg6[%c0_113, %c0_114], %312 {strides = array<i32>} : memref<8x128xf32, #tpu.memory_space<vmem>>, vector<8x128xf32>,
    } else {
    }
    return
  }
  func.func @transform_0(%arg0: i32, %arg1: i32) -> (i32, i32, i32) {
    %c0_i32 = arith.constant 0 : i32
    %c0_i32_0 = arith.constant 0 : i32
    return %arg1, %arg0, %c0_i32 : i32, i32, i32
  }
  func.func @transform_1(%arg0: i32, %arg1: i32) -> (i32, i32) {
    %c0_i32 = arith.constant 0 : i32
    %c0_i32_0 = arith.constant 0 : i32
    %c0_i32_1 = arith.constant 0 : i32
    return %c0_i32, %c0_i32_0 : i32, i32
  }
  func.func @transform_2(%arg0: i32, %arg1: i32) -> (i32, i32) {
    %c0_i32 = arith.constant 0 : i32
    %c0_i32_0 = arith.constant 0 : i32
    %c0_i32_1 = arith.constant 0 : i32
    return %c0_i32, %c0_i32_0 : i32, i32
  }
  func.func @transform_3(%arg0: i32, %arg1: i32) -> (i32, i32) {
    %c0_i32 = arith.constant 0 : i32
    %c0_i32_0 = arith.constant 0 : i32
    %c0_i32_1 = arith.constant 0 : i32
    return %c0_i32, %c0_i32_0 : i32, i32
  }
  func.func @transform_4(%arg0: i32, %arg1: i32) -> (i32, i32) {
    %c0_i32 = arith.constant 0 : i32
    %c0_i32_0 = arith.constant 0 : i32
    return %arg0, %c0_i32 : i32, i32
  }
}

</mosaic_0001>

<bundles_post_ra>
// kernel: tpu_custom_call.1
= control target key start
LH: loop header
LB: loop body
LE: loop exit
PB: predicated region body
PF: predicated region fallthrough
CT: control target
= control target key end

     0   :  { %9 = vsyncpa [#allocation5], 0  ;;  %s1997_s0 = inlined_call_operand.hbm [shape: f32[8,8,512], index: 0, kind: input, shape index: {}]   ;;  %s1998_s1 = inlined_call_operand.hbm [shape: bf16[128,512], index: 1, kind: input, shape index: {}]   ;;  %s1999_s2 = inlined_call_operand.hbm [shape: bf16[128,128], index: 2, kind: input, shape index: {}]   ;;  %s2000_s3 = inlined_call_operand.vmem [shape: f32[1,128], index: 3, kind: input, shape index: {}]   ;;  %s2001_s4 = inlined_call_operand.hbm [shape: f32[8,128], index: 4, kind: output, shape index: {}]  }
   0x1   :  { %10 = vsyncpa [#allocation8], 0 }
   0x2   :  { %11 = vsyncpa [#allocation6], 0  ;;  %s1608_s15 = smov [#allocation7]  }
   0x3   :  { %s29_s16 = sshll.u32 %s1608_s15, 4  ;;  %s30_s16 = int_to_ptr.vmem [resolvable:$true] %s29_s16 }
   0x4   :  { %s1530_s17 = scalar_lea.vmem %s30_s16, 4096  ;;  %p1535_p1 = scmp.lt.s32.totalorder %s30_s16, %s30_s16 }
   0x5   :  { %p1531_p0 = scmp.ne.s32.totalorder %s30_s16, %s1530_s17  ;;  %p1536_p2 = scmp.lt.s32.totalorder %s1530_s17, %s1530_s17 }
   0x7   :  { %p1537_p3 = por %p1536_p2, %p1535_p1 }
   0x9   :  { %p1538_p4 = pnand %p1537_p3, %p1531_p0 }
   0xb   :  { %1541 = shalt.err (!%p1538_p4)
}
   0xc   :  { %s1609_s18 = smov 256   ;;  %s1610_s19 = smov 16  }
   0xd   :  { %35 = dma.hbm_to_vmem [thread:$0]  %s1998_s1, 4096, %s30_s16, [#allocation8], %s1609_s18, %s1609_s18, %s1610_s19  }
   0xe   :  { %s1611_s22 = smov [#allocation4]  }
   0xf   :  { %s17_s23 = sshll.u32 %s1611_s22, 4  ;;  %s18_s23 = int_to_ptr.vmem [resolvable:$true] %s17_s23 }
  0x10   :  { %s1550_s24 = scalar_lea.vmem %s18_s23, 4096  ;;  %p1555_p6 = scmp.lt.s32.totalorder %s18_s23, %s18_s23 }
  0x11   :  { %p1551_p5 = scmp.ne.s32.totalorder %s18_s23, %s1550_s24  ;;  %p1556_p7 = scmp.lt.s32.totalorder %s1550_s24, %s1550_s24 }
  0x13   :  { %p1557_p8 = por %p1556_p7, %p1555_p6 }
  0x15   :  { %p1558_p9 = pnand %p1557_p8, %p1551_p5 }
  0x17   :  { %1561 = shalt.err (!%p1558_p9)
}
  0x18   :  { %s1612_s25 = smov 512   ;;  %s1613_s26 = smov 32  }
  0x19   :  { %23 = dma.hbm_to_vmem [thread:$0]  %s1997_s0, 4096, %s18_s23, [#allocation5], %s1612_s25, %s1612_s25, %s1613_s26  }
  0x1a   :  { %s1614_s29 = smov [#allocation9]  }
  0x1b   :  { %s41_s30 = sshll.u32 %s1614_s29, 4  ;;  %s42_s30 = int_to_ptr.vmem [resolvable:$true] %s41_s30 }
  0x1c   :  { %s1570_s1 = scalar_lea.vmem %s42_s30, 1024  ;;  %p1575_p11 = scmp.lt.s32.totalorder %s42_s30, %s42_s30 }
  0x1d   :  { %p1571_p10 = scmp.ne.s32.totalorder %s42_s30, %s1570_s1  ;;  %p1576_p12 = scmp.lt.s32.totalorder %s1570_s1, %s1570_s1 }
  0x1f   :  { %p1577_p13 = por %p1576_p12, %p1575_p11 }
  0x21   :  { %p1578_p0 = pnand %p1577_p13, %p1571_p10 }
  0x23   :  { %1581 = shalt.err (!%p1578_p0)
}
  0x24   :  { %s1615_s5 = smov 64   ;;  %s1616_s6 = smov 4  }
  0x25   :  { %47 = dma.hbm_to_vmem [thread:$0]  %s1999_s2, 1024, %s42_s30, [#allocation8], %s1615_s5, %s1615_s5, %s1616_s6  }
  0x26   :  { %1602 = dma.done.wait [#allocation5], 4096  }
  0x27   :  { %1603 = vsyncadd [#allocation5], 4294963200 }
  0x28   :  { %1604 = dma.done.wait [#allocation8], 5120  }
  0x29   :  { %1605 = vsyncadd [#allocation8], 4294962176  ;;  %v1617_v0 = vmov 0   ;;  %v1658_v1 = vld [vmem:[#allocation7 + $0xe4] ss:$16 sps:$4 sm:$0xff]   ;;  %v1618_v33 = vmov 0.0|0.0  }
  0x2a   :  { %297 = vmatprep.mubr.bf16.mxu0 %v1617_v0  ;;  %338 = vmatprep.mubr.bf16.mxu1 %v1617_v0  ;;  %v1660_v2 = vld [vmem:[#allocation7 + $0xe0] ss:$16 sps:$4 sm:$0xff]   ;;  %v1663_v3 = vld [vmem:[#allocation7 + $0xec] ss:$16 sps:$4 sm:$0xff]   ;;  %v1665_v4 = vld [vmem:[#allocation7 + $0xe8] ss:$16 sps:$4 sm:$0xff]  }
  0x2b   :  { %265 = vmatprep.subr.bf16.mxu0 %v1658_v1  ;;  %v1668_v5 = vld [vmem:[#allocation7 + $0xc4] ss:$16 sps:$4 sm:$0xff]   ;;  %v1670_v6 = vld [vmem:[#allocation7 + $0xc0] ss:$16 sps:$4 sm:$0xff]   ;;  %306 = vmatprep.subr.bf16.mxu1 %v1663_v3  ;;  %v1673_v7 = vld [vmem:[#allocation7 + $0xcc] ss:$16 sps:$4 sm:$0xff]  }
  0x2c   :  { %266 = vmatpush1.bf16.msra.mxu0 %v1660_v2  ;;  %307 = vmatpush1.bf16.msra.mxu1 %v1665_v4  ;;  %v1677_v8 = vld [vmem:[#allocation7 + $0xc8] ss:$16 sps:$4 sm:$0xff]   ;;  %v1680_v9 = vld [vmem:[#allocation7 + $0xa4] ss:$16 sps:$4 sm:$0xff]   ;;  %v1683_v10 = vld [vmem:[#allocation7 + $0xa0] ss:$16 sps:$4 sm:$0xff]  }
  0x2d   :  { %267 = vmatprep.subr.bf16.mxu0 %v1668_v5  ;;  %308 = vmatprep.subr.bf16.mxu1 %v1673_v7  ;;  %v1685_v11 = vld [vmem:[#allocation7 + $0xac] ss:$16 sps:$4 sm:$0xff]   ;;  %v1688_v12 = vld [vmem:[#allocation7 + $0x84] ss:$16 sps:$4 sm:$0xff]   ;;  %v1691_v13 = vld [vmem:[#allocation7 + $0xa8] ss:$16 sps:$4 sm:$0xff]  }
  0x2e   :  { %v1694_v14 = vld [vmem:[#allocation7 + $0x8c] ss:$16 sps:$4 sm:$0xff]   ;;  %v1697_v15 = vld [vmem:[#allocation7 + $0x80] ss:$16 sps:$4 sm:$0xff]   ;;  %v1700_v16 = vld [vmem:[#allocation7 + $0x64] ss:$16 sps:$4 sm:$0xff]  }
  0x2f   :  { %v1703_v17 = vld [vmem:[#allocation7 + $0x88] ss:$16 sps:$4 sm:$0xff]   ;;  %v1706_v18 = vld [vmem:[#allocation7 + $0x6c] ss:$16 sps:$4 sm:$0xff]   ;;  %v1709_v19 = vld [vmem:[#allocation7 + $0x60] ss:$16 sps:$4 sm:$0xff]  }
  0x30   :  { %268 = vmatpush1.bf16.msra.mxu0 %v1670_v6  ;;  %309 = vmatpush1.bf16.msra.mxu1 %v1677_v8  ;;  %v1712_v20 = vld [vmem:[#allocation7 + $0x44] ss:$16 sps:$4 sm:$0xff]   ;;  %v1715_v21 = vld [vmem:[#allocation7 + $0x68] ss:$16 sps:$4 sm:$0xff]   ;;  %v1718_v22 = vld [vmem:[#allocation7 + $0x4c] ss:$16 sps:$4 sm:$0xff]  }
  0x31   :  { %269 = vmatprep.subr.bf16.mxu0 %v1680_v9  ;;  %310 = vmatprep.subr.bf16.mxu1 %v1685_v11  ;;  %v1721_v23 = vld [vmem:[#allocation7 + $0x40] ss:$16 sps:$4 sm:$0xff]   ;;  %v1723_v24 = vld [vmem:[#allocation7 + $0x48] ss:$16 sps:$4 sm:$0xff]   ;;  %v1726_v25 = vld [vmem:[#allocation7 + $0x24] ss:$16 sps:$4 sm:$0xff]  }
  0x32   :  { %v1729_v26 = vld [vmem:[#allocation7 + $0x20] ss:$16 sps:$4 sm:$0xff]   ;;  %v1731_v27 = vld [vmem:[#allocation7 + $0x2c] ss:$16 sps:$4 sm:$0xff]   ;;  %v1734_v28 = vld [vmem:[#allocation7 + $0x4] ss:$16 sps:$4 sm:$0xff]  }
  0x33   :  { %v1737_v29 = vld [vmem:[#allocation7 + $0x28] ss:$16 sps:$4 sm:$0xff]   ;;  %v1740_v30 = vld [vmem:[#allocation7 + $0xc] ss:$16 sps:$4 sm:$0xff]   ;;  %v1745_v31 = vld [vmem:[#allocation7] ss:$16 sps:$4 sm:$0xff]  }
  0x34   :  { %270 = vmatpush1.bf16.msra.mxu0 %v1683_v10  ;;  %311 = vmatpush1.bf16.msra.mxu1 %v1691_v13  ;;  %v1749_v32 = vld [vmem:[#allocation7 + $0x8] ss:$16 sps:$4 sm:$0xff]   ;;  %v100_v34 = vld [vmem:[#allocation4] sm:$0xff]  ;;  %v102_v39 = vld [vmem:[#allocation4 + $0x10] sm:$0xff]  ;;  %vm1620_vm0 = vmmov 0   ;;  %s1621_s9 = smov [#allocation10]  }
  0x35   :  { %271 = vmatprep.subr.bf16.mxu0 %v1688_v12  ;;  %312 = vmatprep.subr.bf16.mxu1 %v1694_v14  ;;  %v101_v36 = vld [vmem:[#allocation4 + $0x8] sm:$0xff]  ;;  %v103_v50 = vld [vmem:[#allocation4 + $0x18] sm:$0xff]  ;;  %s1263_s10 = sshll.u32 %s1621_s9, 4  ;;  %s1264_s10 = int_to_ptr.vmem [resolvable:$true] %s1263_s10 }
  0x36   :  { %s1582_s11 = scalar_lea.vmem %s1264_s10, 128  ;;  %p1587_p2 = scmp.lt.s32.totalorder %s1264_s10, %s1264_s10 }
  0x37   :  { %p1583_p1 = scmp.ne.s32.totalorder %s1264_s10, %s1582_s11  ;;  %p1588_p3 = scmp.lt.s32.totalorder %s1582_s11, %s1582_s11 }
  0x38   :  { %272 = vmatpush1.bf16.msra.mxu0 %v1697_v15  ;;  %313 = vmatpush1.bf16.msra.mxu1 %v1703_v17 }
  0x39   :  { %273 = vmatprep.subr.bf16.mxu0 %v1700_v16  ;;  %314 = vmatprep.subr.bf16.mxu1 %v1706_v18  ;;  %p1589_p4 = por %p1588_p3, %p1587_p2 }
  0x3b   :  { %p1590_p5 = pnand %p1589_p4, %p1583_p1 }
  0x3c   :  { %274 = vmatpush1.bf16.msra.mxu0 %v1709_v19  ;;  %315 = vmatpush1.bf16.msra.mxu1 %v1715_v21 }
  0x3d   :  { %275 = vmatprep.subr.bf16.mxu0 %v1712_v20  ;;  %316 = vmatprep.subr.bf16.mxu1 %v1718_v22 }
  0x40   :  { %276 = vmatpush1.bf16.msra.mxu0 %v1721_v23  ;;  %317 = vmatpush1.bf16.msra.mxu1 %v1723_v24 }
  0x41   :  { %277 = vmatprep.subr.bf16.mxu0 %v1726_v25  ;;  %318 = vmatprep.subr.bf16.mxu1 %v1731_v27 }
  0x44   :  { %278 = vmatpush1.bf16.msra.mxu0 %v1729_v26  ;;  %319 = vmatpush1.bf16.msra.mxu1 %v1737_v29 }
  0x45   :  { %279 = vmatprep.subr.bf16.mxu0 %v1734_v28  ;;  %320 = vmatprep.subr.bf16.mxu1 %v1740_v30 }
  0x48   :  { %280 = vmatpush1.bf16.msra.mxu0 %v1745_v31  ;;  %321 = vmatpush1.bf16.msra.mxu1 %v1749_v32 }
  0x49   :  { %375 = vmatprep.subr.bf16.mxu0 %v1658_v1  ;;  %416 = vmatprep.subr.bf16.mxu1 %v1663_v3 }
  0x4b   :  { %298 = vmatmul.mubr.bf16.vlgmr.msra.gmra.mxu0 %v1618_v33  ;;  %339 = vmatmul.mubr.bf16.vlgmr.msra.gmra.mxu1 %v1618_v33 }
  0x4c   :  { %376 = vmatpush1.bf16.msra.mxu0 %v1660_v2  ;;  %407 = vmatprep.mubr.bf16.mxu0 %v1617_v0 }
  0x4d   :  { %377 = vmatprep.subr.bf16.mxu0 %v1668_v5  ;;  %417 = vmatpush1.bf16.msra.mxu1 %v1665_v4 }
  0x4e   :  { %448 = vmatprep.mubr.bf16.mxu1 %v1617_v0  ;;  %418 = vmatprep.subr.bf16.mxu1 %v1673_v7 }
  0x50   :  { %378 = vmatpush1.bf16.msra.mxu0 %v1670_v6 }
  0x51   :  { %379 = vmatprep.subr.bf16.mxu0 %v1680_v9  ;;  %419 = vmatpush1.bf16.msra.mxu1 %v1677_v8 }
  0x52   :  { %420 = vmatprep.subr.bf16.mxu1 %v1685_v11 }
  0x54   :  { %380 = vmatpush1.bf16.msra.mxu0 %v1683_v10 }
  0x55   :  { %381 = vmatprep.subr.bf16.mxu0 %v1688_v12  ;;  %421 = vmatpush1.bf16.msra.mxu1 %v1691_v13 }
  0x56   :  { %422 = vmatprep.subr.bf16.mxu1 %v1694_v14 }
  0x58   :  { %382 = vmatpush1.bf16.msra.mxu0 %v1697_v15 }
  0x59   :  { %383 = vmatprep.subr.bf16.mxu0 %v1700_v16  ;;  %423 = vmatpush1.bf16.msra.mxu1 %v1703_v17 }
  0x5a   :  { %424 = vmatprep.subr.bf16.mxu1 %v1706_v18 }
  0x5c   :  { %384 = vmatpush1.bf16.msra.mxu0 %v1709_v19 }
  0x5d   :  { %385 = vmatprep.subr.bf16.mxu0 %v1712_v20  ;;  %425 = vmatpush1.bf16.msra.mxu1 %v1715_v21 }
  0x5e   :  { %426 = vmatprep.subr.bf16.mxu1 %v1718_v22 }
  0x60   :  { %386 = vmatpush1.bf16.msra.mxu0 %v1721_v23 }
  0x61   :  { %387 = vmatprep.subr.bf16.mxu0 %v1726_v25  ;;  %427 = vmatpush1.bf16.msra.mxu1 %v1723_v24 }
  0x62   :  { %428 = vmatprep.subr.bf16.mxu1 %v1731_v27 }
  0x64   :  { %388 = vmatpush1.bf16.msra.mxu0 %v1729_v26 }
  0x65   :  { %389 = vmatprep.subr.bf16.mxu0 %v1734_v28  ;;  %429 = vmatpush1.bf16.msra.mxu1 %v1737_v29 }
  0x66   :  { %430 = vmatprep.subr.bf16.mxu1 %v1740_v30 }
  0x68   :  { %390 = vmatpush1.bf16.msra.mxu0 %v1745_v31 }
  0x69   :  { %485 = vmatprep.subr.bf16.mxu0 %v1658_v1  ;;  %431 = vmatpush1.bf16.msra.mxu1 %v1749_v32 }
  0x6a   :  { %526 = vmatprep.subr.bf16.mxu1 %v1663_v3 }
 0x10b   :  { %v299_v35 = vpop.f32.mrf.mxu0  ;;  %v340_v40 = vpop.f32.mrf.mxu1 }
 0x10c   :  { %v347_v37 = vadd.f32 %v299_v35, %v100_v34  ;;  %v349_v46 = vadd.f32 %v340_v40, %v102_v39 }
 0x10d   :  { %v301_v38 = vpop.f32.mrf.mxu0  ;;  %v342_v44 = vpop.f32.mrf.mxu1 }
 0x10e   :  { %v351_v41 = vmul.f32 0.5, %v347_v37  ;;  %v348_v42 = vadd.f32 %v301_v38, %v101_v36  ;;  %v350_v51 = vadd.f32 %v342_v44, %v103_v50  ;;  %v370_v38 = vld [vmem:[#allocation4 + $0x20] sm:$0xff] }
 0x10f   :  { %v303_v43 = vpop.f32.mrf.mxu0  ;;  %v344_v48 = vpop.f32.mrf.mxu1 }
 0x110   :  { %1413 = vtanh.f32 %v351_v41  ;;  %v355_v45 = vmul.f32 0.5, %v348_v42  ;;  %v360_v52 = vmul.f32 0.5, %v350_v51  ;;  %v371_v41 = vld [vmem:[#allocation4 + $0x28] sm:$0xff] }
 0x111   :  { %v304_v47 = vpop.f32.mrf.mxu0  ;;  %v345_v49 = vpop.f32.mrf.mxu1 }
 0x112   :  { %1415 = vtanh.f32 %v355_v45  ;;  %v372_v47 = vld [vmem:[#allocation4 + $0x30] sm:$0xff] }
 0x113   :  { %1417 = vtanh.f32 %v349_v46 }
 0x114   :  { %1419 = vtanh.f32 %v360_v52 }
 0x11d   :  { %v1414_v53 = vpop.eup %1413 }
 0x11e   :  { %v353_v54 = vmul.f32 0.5, %v1414_v53 }
 0x11f   :  { %v1416_v55 = vpop.eup %1415 }
 0x120   :  { %v354_v56 = vadd.f32 0.5, %v353_v54  ;;  %v357_v57 = vmul.f32 0.5, %v1416_v55  ;;  %v1418_v58 = vpop.eup %1417  ;;  %v373_v54 = vld [vmem:[#allocation4 + $0x38] sm:$0xff] }
 0x121   :  { %v1420_v63 = vpop.eup %1419 }
 0x122   :  { %v358_v59 = vadd.f32 0.5, %v357_v57  ;;  %v365_v61 = vmul.f32 %v1418_v58, %v354_v56  ;;  %v362_v33 = vmul.f32 0.5, %v1420_v63 }
 0x124   :  { %v364_v60 = vmul.f32 0.0, %v358_v59  ;;  %v363_v34 = vadd.f32 0.5, %v362_v33 }
 0x126   :  { %v1790_v62 = vadd.f32 %v365_v61, %v364_v60 }
 0x128   :  { %1421 = vtanh.f32 %v1790_v62 }
 0x135   :  { %v1422_v35 = vpop.eup %1421 }
 0x136   :  { %v368_v36 = vmul.f32 %v1422_v35, %v363_v34 }
 0x138   :  { %v374_v37 = vpack.c.bf16 %v368_v36, %v368_v36 }
 0x13a   :  { %408 = vmatmul.mubr.bf16.vlgmr.msra.gmra.mxu0 %v374_v37  ;;  %449 = vmatmul.mubr.bf16.vlgmr.msra.gmra.mxu1 %v374_v37 }
 0x13b   :  { %486 = vmatpush1.bf16.msra.mxu0 %v1660_v2  ;;  %527 = vmatpush1.bf16.msra.mxu1 %v1665_v4 }
 0x13c   :  { %487 = vmatprep.subr.bf16.mxu0 %v1668_v5  ;;  %528 = vmatprep.subr.bf16.mxu1 %v1673_v7 }
 0x13d   :  { %517 = vmatprep.mubr.bf16.mxu0 %v1617_v0  ;;  %558 = vmatprep.mubr.bf16.mxu1 %v1617_v0 }
 0x13f   :  { %488 = vmatpush1.bf16.msra.mxu0 %v1670_v6  ;;  %529 = vmatpush1.bf16.msra.mxu1 %v1677_v8 }
 0x140   :  { %489 = vmatprep.subr.bf16.mxu0 %v1680_v9  ;;  %530 = vmatprep.subr.bf16.mxu1 %v1685_v11 }
 0x143   :  { %490 = vmatpush1.bf16.msra.mxu0 %v1683_v10  ;;  %531 = vmatpush1.bf16.msra.mxu1 %v1691_v13 }
 0x144   :  { %491 = vmatprep.subr.bf16.mxu0 %v1688_v12  ;;  %532 = vmatprep.subr.bf16.mxu1 %v1694_v14 }
 0x147   :  { %492 = vmatpush1.bf16.msra.mxu0 %v1697_v15  ;;  %533 = vmatpush1.bf16.msra.mxu1 %v1703_v17 }
 0x148   :  { %493 = vmatprep.subr.bf16.mxu0 %v1700_v16  ;;  %534 = vmatprep.subr.bf16.mxu1 %v1706_v18 }
 0x14b   :  { %494 = vmatpush1.bf16.msra.mxu0 %v1709_v19  ;;  %535 = vmatpush1.bf16.msra.mxu1 %v1715_v21 }
 0x14c   :  { %495 = vmatprep.subr.bf16.mxu0 %v1712_v20  ;;  %536 = vmatprep.subr.bf16.mxu1 %v1718_v22 }
 0x14f   :  { %496 = vmatpush1.bf16.msra.mxu0 %v1721_v23  ;;  %537 = vmatpush1.bf16.msra.mxu1 %v1723_v24 }
 0x150   :  { %497 = vmatprep.subr.bf16.mxu0 %v1726_v25  ;;  %538 = vmatprep.subr.bf16.mxu1 %v1731_v27 }
 0x153   :  { %498 = vmatpush1.bf16.msra.mxu0 %v1729_v26  ;;  %539 = vmatpush1.bf16.msra.mxu1 %v1737_v29 }
 0x154   :  { %499 = vmatprep.subr.bf16.mxu0 %v1734_v28  ;;  %540 = vmatprep.subr.bf16.mxu1 %v1740_v30 }
 0x157   :  { %500 = vmatpush1.bf16.msra.mxu0 %v1745_v31  ;;  %541 = vmatpush1.bf16.msra.mxu1 %v1749_v32 }
 0x158   :  { %595 = vmatprep.subr.bf16.mxu0 %v1658_v1  ;;  %636 = vmatprep.subr.bf16.mxu1 %v1663_v3 }
 0x1fa   :  { %v409_v39 = vpop.f32.mrf.mxu0  ;;  %v450_v40 = vpop.f32.mrf.mxu1 }
 0x1fb   :  { %v457_v42 = vadd.f32 %v409_v39, %v370_v38  ;;  %v459_v53 = vadd.f32 %v450_v40, %v372_v47 }
 0x1fc   :  { %v411_v43 = vpop.f32.mrf.mxu0  ;;  %v452_v44 = vpop.f32.mrf.mxu1 }
 0x1fd   :  { %v461_v45 = vmul.f32 0.5, %v457_v42  ;;  %v458_v46 = vadd.f32 %v411_v43, %v371_v41  ;;  %v460_v55 = vadd.f32 %v452_v44, %v373_v54 }
 0x1fe   :  { %v413_v48 = vpop.f32.mrf.mxu0  ;;  %v454_v49 = vpop.f32.mrf.mxu1 }
 0x1ff   :  { %1423 = vtanh.f32 %v461_v45  ;;  %v465_v50 = vmul.f32 0.5, %v458_v46  ;;  %v470_v56 = vmul.f32 0.5, %v460_v55  ;;  %v481_v45 = vld [vmem:[#allocation4 + $0x48] sm:$0xff] }
 0x200   :  { %v414_v51 = vpop.f32.mrf.mxu0  ;;  %v455_v52 = vpop.f32.mrf.mxu1 }
 0x201   :  { %1425 = vtanh.f32 %v465_v50  ;;  %v482_v51 = vld [vmem:[#allocation4 + $0x50] sm:$0xff] }
 0x202   :  { %1427 = vtanh.f32 %v459_v53 }
 0x203   :  { %1429 = vtanh.f32 %v470_v56 }
 0x20c   :  { %v1424_v57 = vpop.eup %1423 }
 0x20d   :  { %v463_v58 = vmul.f32 0.5, %v1424_v57 }
 0x20e   :  { %v1426_v59 = vpop.eup %1425 }
 0x20f   :  { %v464_v60 = vadd.f32 0.5, %v463_v58  ;;  %v467_v61 = vmul.f32 0.5, %v1426_v59  ;;  %v1428_v33 = vpop.eup %1427  ;;  %v483_v58 = vld [vmem:[#allocation4 + $0x58] sm:$0xff] }
 0x210   :  { %v1430_v37 = vpop.eup %1429 }
 0x211   :  { %v468_v63 = vadd.f32 0.5, %v467_v61  ;;  %v475_v35 = vmul.f32 %v1428_v33, %v464_v60  ;;  %v472_v38 = vmul.f32 0.5, %v1430_v37 }
 0x213   :  { %v474_v34 = vmul.f32 %v468_v63, %v1790_v62  ;;  %v473_v39 = vadd.f32 0.5, %v472_v38  ;;  %v480_v62 = vld [vmem:[#allocation4 + $0x40] sm:$0xff] }
 0x215   :  { %v1828_v36 = vadd.f32 %v475_v35, %v474_v34 }
 0x217   :  { %1431 = vtanh.f32 %v1828_v36 }
 0x224   :  { %v1432_v40 = vpop.eup %1431 }
 0x225   :  { %v478_v41 = vmul.f32 %v1432_v40, %v473_v39 }
 0x227   :  { %v484_v42 = vpack.c.bf16 %v478_v41, %v478_v41 }
 0x229   :  { %518 = vmatmul.mubr.bf16.vlgmr.msra.gmra.mxu0 %v484_v42  ;;  %559 = vmatmul.mubr.bf16.vlgmr.msra.gmra.mxu1 %v484_v42 }
 0x22a   :  { %596 = vmatpush1.bf16.msra.mxu0 %v1660_v2  ;;  %637 = vmatpush1.bf16.msra.mxu1 %v1665_v4 }
 0x22b   :  { %597 = vmatprep.subr.bf16.mxu0 %v1668_v5  ;;  %638 = vmatprep.subr.bf16.mxu1 %v1673_v7 }
 0x22c   :  { %627 = vmatprep.mubr.bf16.mxu0 %v1617_v0  ;;  %668 = vmatprep.mubr.bf16.mxu1 %v1617_v0 }
 0x22e   :  { %598 = vmatpush1.bf16.msra.mxu0 %v1670_v6  ;;  %639 = vmatpush1.bf16.msra.mxu1 %v1677_v8 }
 0x22f   :  { %599 = vmatprep.subr.bf16.mxu0 %v1680_v9  ;;  %640 = vmatprep.subr.bf16.mxu1 %v1685_v11 }
 0x232   :  { %600 = vmatpush1.bf16.msra.mxu0 %v1683_v10  ;;  %641 = vmatpush1.bf16.msra.mxu1 %v1691_v13 }
 0x233   :  { %601 = vmatprep.subr.bf16.mxu0 %v1688_v12  ;;  %642 = vmatprep.subr.bf16.mxu1 %v1694_v14 }
 0x236   :  { %602 = vmatpush1.bf16.msra.mxu0 %v1697_v15  ;;  %643 = vmatpush1.bf16.msra.mxu1 %v1703_v17 }
 0x237   :  { %603 = vmatprep.subr.bf16.mxu0 %v1700_v16  ;;  %644 = vmatprep.subr.bf16.mxu1 %v1706_v18 }
 0x23a   :  { %604 = vmatpush1.bf16.msra.mxu0 %v1709_v19  ;;  %645 = vmatpush1.bf16.msra.mxu1 %v1715_v21 }
 0x23b   :  { %605 = vmatprep.subr.bf16.mxu0 %v1712_v20  ;;  %646 = vmatprep.subr.bf16.mxu1 %v1718_v22 }
 0x23e   :  { %606 = vmatpush1.bf16.msra.mxu0 %v1721_v23  ;;  %647 = vmatpush1.bf16.msra.mxu1 %v1723_v24 }
 0x23f   :  { %607 = vmatprep.subr.bf16.mxu0 %v1726_v25  ;;  %648 = vmatprep.subr.bf16.mxu1 %v1731_v27 }
 0x242   :  { %608 = vmatpush1.bf16.msra.mxu0 %v1729_v26  ;;  %649 = vmatpush1.bf16.msra.mxu1 %v1737_v29 }
 0x243   :  { %609 = vmatprep.subr.bf16.mxu0 %v1734_v28  ;;  %650 = vmatprep.subr.bf16.mxu1 %v1740_v30 }
 0x246   :  { %610 = vmatpush1.bf16.msra.mxu0 %v1745_v31  ;;  %651 = vmatpush1.bf16.msra.mxu1 %v1749_v32 }
 0x247   :  { %705 = vmatprep.subr.bf16.mxu0 %v1658_v1  ;;  %746 = vmatprep.subr.bf16.mxu1 %v1663_v3 }
 0x2e9   :  { %v519_v43 = vpop.f32.mrf.mxu0  ;;  %v560_v44 = vpop.f32.mrf.mxu1 }
 0x2ea   :  { %v567_v46 = vadd.f32 %v519_v43, %v480_v62  ;;  %v569_v57 = vadd.f32 %v560_v44, %v482_v51 }
 0x2eb   :  { %v521_v47 = vpop.f32.mrf.mxu0  ;;  %v562_v48 = vpop.f32.mrf.mxu1 }
 0x2ec   :  { %v571_v49 = vmul.f32 0.5, %v567_v46  ;;  %v568_v50 = vadd.f32 %v521_v47, %v481_v45  ;;  %v570_v59 = vadd.f32 %v562_v48, %v483_v58 }
 0x2ed   :  { %v523_v52 = vpop.f32.mrf.mxu0  ;;  %v564_v53 = vpop.f32.mrf.mxu1 }
 0x2ee   :  { %1433 = vtanh.f32 %v571_v49  ;;  %v575_v54 = vmul.f32 0.5, %v568_v50  ;;  %v580_v60 = vmul.f32 0.5, %v570_v59  ;;  %v591_v49 = vld [vmem:[#allocation4 + $0x68] sm:$0xff] }
 0x2ef   :  { %v524_v55 = vpop.f32.mrf.mxu0  ;;  %v565_v56 = vpop.f32.mrf.mxu1 }
 0x2f0   :  { %1435 = vtanh.f32 %v575_v54  ;;  %v592_v55 = vld [vmem:[#allocation4 + $0x70] sm:$0xff] }
 0x2f1   :  { %1437 = vtanh.f32 %v569_v57 }
 0x2f2   :  { %1439 = vtanh.f32 %v580_v60 }
 0x2fb   :  { %v1434_v61 = vpop.eup %1433 }
 0x2fc   :  { %v573_v63 = vmul.f32 0.5, %v1434_v61 }
 0x2fd   :  { %v1436_v33 = vpop.eup %1435 }
 0x2fe   :  { %v574_v34 = vadd.f32 0.5, %v573_v63  ;;  %v577_v35 = vmul.f32 0.5, %v1436_v33  ;;  %v1438_v38 = vpop.eup %1437  ;;  %v593_v63 = vld [vmem:[#allocation4 + $0x78] sm:$0xff] }
 0x2ff   :  { %v1440_v42 = vpop.eup %1439 }
 0x300   :  { %v578_v37 = vadd.f32 0.5, %v577_v35  ;;  %v585_v40 = vmul.f32 %v1438_v38, %v574_v34  ;;  %v582_v62 = vmul.f32 0.5, %v1440_v42 }
 0x302   :  { %v584_v39 = vmul.f32 %v578_v37, %v1828_v36  ;;  %v583_v43 = vadd.f32 0.5, %v582_v62  ;;  %v590_v36 = vld [vmem:[#allocation4 + $0x60] sm:$0xff] }
 0x304   :  { %v1866_v41 = vadd.f32 %v585_v40, %v584_v39 }
 0x306   :  { %1441 = vtanh.f32 %v1866_v41 }
 0x313   :  { %v1442_v44 = vpop.eup %1441 }
 0x314   :  { %v588_v45 = vmul.f32 %v1442_v44, %v583_v43 }
 0x316   :  { %v594_v46 = vpack.c.bf16 %v588_v45, %v588_v45 }
 0x318   :  { %628 = vmatmul.mubr.bf16.vlgmr.msra.gmra.mxu0 %v594_v46  ;;  %669 = vmatmul.mubr.bf16.vlgmr.msra.gmra.mxu1 %v594_v46 }
 0x319   :  { %706 = vmatpush1.bf16.msra.mxu0 %v1660_v2  ;;  %747 = vmatpush1.bf16.msra.mxu1 %v1665_v4 }
 0x31a   :  { %707 = vmatprep.subr.bf16.mxu0 %v1668_v5  ;;  %748 = vmatprep.subr.bf16.mxu1 %v1673_v7 }
 0x31b   :  { %737 = vmatprep.mubr.bf16.mxu0 %v1617_v0  ;;  %778 = vmatprep.mubr.bf16.mxu1 %v1617_v0 }
 0x31d   :  { %708 = vmatpush1.bf16.msra.mxu0 %v1670_v6  ;;  %749 = vmatpush1.bf16.msra.mxu1 %v1677_v8 }
 0x31e   :  { %709 = vmatprep.subr.bf16.mxu0 %v1680_v9  ;;  %750 = vmatprep.subr.bf16.mxu1 %v1685_v11 }
 0x321   :  { %710 = vmatpush1.bf16.msra.mxu0 %v1683_v10  ;;  %751 = vmatpush1.bf16.msra.mxu1 %v1691_v13 }
 0x322   :  { %711 = vmatprep.subr.bf16.mxu0 %v1688_v12  ;;  %752 = vmatprep.subr.bf16.mxu1 %v1694_v14 }
 0x325   :  { %712 = vmatpush1.bf16.msra.mxu0 %v1697_v15  ;;  %753 = vmatpush1.bf16.msra.mxu1 %v1703_v17 }
 0x326   :  { %713 = vmatprep.subr.bf16.mxu0 %v1700_v16  ;;  %754 = vmatprep.subr.bf16.mxu1 %v1706_v18 }
 0x329   :  { %714 = vmatpush1.bf16.msra.mxu0 %v1709_v19  ;;  %755 = vmatpush1.bf16.msra.mxu1 %v1715_v21 }
 0x32a   :  { %715 = vmatprep.subr.bf16.mxu0 %v1712_v20  ;;  %756 = vmatprep.subr.bf16.mxu1 %v1718_v22 }
 0x32d   :  { %716 = vmatpush1.bf16.msra.mxu0 %v1721_v23  ;;  %757 = vmatpush1.bf16.msra.mxu1 %v1723_v24 }
 0x32e   :  { %717 = vmatprep.subr.bf16.mxu0 %v1726_v25  ;;  %758 = vmatprep.subr.bf16.mxu1 %v1731_v27 }
 0x331   :  { %718 = vmatpush1.bf16.msra.mxu0 %v1729_v26  ;;  %759 = vmatpush1.bf16.msra.mxu1 %v1737_v29 }
 0x332   :  { %719 = vmatprep.subr.bf16.mxu0 %v1734_v28  ;;  %760 = vmatprep.subr.bf16.mxu1 %v1740_v30 }
 0x335   :  { %720 = vmatpush1.bf16.msra.mxu0 %v1745_v31  ;;  %761 = vmatpush1.bf16.msra.mxu1 %v1749_v32 }
 0x336   :  { %815 = vmatprep.subr.bf16.mxu0 %v1658_v1  ;;  %856 = vmatprep.subr.bf16.mxu1 %v1663_v3 }
 0x3d8   :  { %v629_v47 = vpop.f32.mrf.mxu0  ;;  %v670_v48 = vpop.f32.mrf.mxu1 }
 0x3d9   :  { %v677_v50 = vadd.f32 %v629_v47, %v590_v36  ;;  %v679_v61 = vadd.f32 %v670_v48, %v592_v55 }
 0x3da   :  { %v631_v51 = vpop.f32.mrf.mxu0  ;;  %v672_v52 = vpop.f32.mrf.mxu1 }
 0x3db   :  { %v681_v53 = vmul.f32 0.5, %v677_v50  ;;  %v678_v54 = vadd.f32 %v631_v51, %v591_v49  ;;  %v680_v33 = vadd.f32 %v672_v52, %v593_v63 }
 0x3dc   :  { %v633_v56 = vpop.f32.mrf.mxu0  ;;  %v674_v57 = vpop.f32.mrf.mxu1 }
 0x3dd   :  { %1443 = vtanh.f32 %v681_v53  ;;  %v685_v58 = vmul.f32 0.5, %v678_v54  ;;  %v690_v34 = vmul.f32 0.5, %v680_v33  ;;  %v701_v53 = vld [vmem:[#allocation4 + $0x88] sm:$0xff] }
 0x3de   :  { %v634_v59 = vpop.f32.mrf.mxu0  ;;  %v675_v60 = vpop.f32.mrf.mxu1 }
 0x3df   :  { %1445 = vtanh.f32 %v685_v58  ;;  %v702_v59 = vld [vmem:[#allocation4 + $0x90] sm:$0xff] }
 0x3e0   :  { %1447 = vtanh.f32 %v679_v61 }
 0x3e1   :  { %1449 = vtanh.f32 %v690_v34 }
 0x3ea   :  { %v1444_v35 = vpop.eup %1443 }
 0x3eb   :  { %v683_v37 = vmul.f32 0.5, %v1444_v35 }
 0x3ec   :  { %v1446_v38 = vpop.eup %1445 }
 0x3ed   :  { %v684_v39 = vadd.f32 0.5, %v683_v37  ;;  %v687_v40 = vmul.f32 0.5, %v1446_v38  ;;  %v1448_v62 = vpop.eup %1447 }
 0x3ee   :  { %v1450_v46 = vpop.eup %1449 }
 0x3ef   :  { %v688_v42 = vadd.f32 0.5, %v687_v40  ;;  %v695_v44 = vmul.f32 %v1448_v62, %v684_v39  ;;  %v692_v36 = vmul.f32 0.5, %v1450_v46 }
 0x3f1   :  { %v694_v43 = vmul.f32 %v688_v42, %v1866_v41  ;;  %v693_v47 = vadd.f32 0.5, %v692_v36  ;;  %v700_v41 = vld [vmem:[#allocation4 + $0x80] sm:$0xff] }
 0x3f3   :  { %v1904_v45 = vadd.f32 %v695_v44, %v694_v43 }
 0x3f5   :  { %1451 = vtanh.f32 %v1904_v45 }
 0x402   :  { %v1452_v48 = vpop.eup %1451 }
 0x403   :  { %v698_v49 = vmul.f32 %v1452_v48, %v693_v47 }
 0x405   :  { %v704_v50 = vpack.c.bf16 %v698_v49, %v698_v49 }
 0x407   :  { %738 = vmatmul.mubr.bf16.vlgmr.msra.gmra.mxu0 %v704_v50  ;;  %779 = vmatmul.mubr.bf16.vlgmr.msra.gmra.mxu1 %v704_v50 }
 0x408   :  { %816 = vmatpush1.bf16.msra.mxu0 %v1660_v2  ;;  %857 = vmatpush1.bf16.msra.mxu1 %v1665_v4 }
 0x409   :  { %817 = vmatprep.subr.bf16.mxu0 %v1668_v5  ;;  %858 = vmatprep.subr.bf16.mxu1 %v1673_v7 }
 0x40a   :  { %847 = vmatprep.mubr.bf16.mxu0 %v1617_v0  ;;  %888 = vmatprep.mubr.bf16.mxu1 %v1617_v0 }
 0x40c   :  { %818 = vmatpush1.bf16.msra.mxu0 %v1670_v6  ;;  %859 = vmatpush1.bf16.msra.mxu1 %v1677_v8 }
 0x40d   :  { %819 = vmatprep.subr.bf16.mxu0 %v1680_v9  ;;  %860 = vmatprep.subr.bf16.mxu1 %v1685_v11 }
 0x410   :  { %820 = vmatpush1.bf16.msra.mxu0 %v1683_v10  ;;  %861 = vmatpush1.bf16.msra.mxu1 %v1691_v13 }
 0x411   :  { %821 = vmatprep.subr.bf16.mxu0 %v1688_v12  ;;  %862 = vmatprep.subr.bf16.mxu1 %v1694_v14 }
 0x414   :  { %822 = vmatpush1.bf16.msra.mxu0 %v1697_v15  ;;  %863 = vmatpush1.bf16.msra.mxu1 %v1703_v17 }
 0x415   :  { %823 = vmatprep.subr.bf16.mxu0 %v1700_v16  ;;  %864 = vmatprep.subr.bf16.mxu1 %v1706_v18 }
 0x418   :  { %824 = vmatpush1.bf16.msra.mxu0 %v1709_v19  ;;  %865 = vmatpush1.bf16.msra.mxu1 %v1715_v21 }
 0x419   :  { %825 = vmatprep.subr.bf16.mxu0 %v1712_v20  ;;  %866 = vmatprep.subr.bf16.mxu1 %v1718_v22 }
 0x41c   :  { %826 = vmatpush1.bf16.msra.mxu0 %v1721_v23  ;;  %867 = vmatpush1.bf16.msra.mxu1 %v1723_v24 }
 0x41d   :  { %827 = vmatprep.subr.bf16.mxu0 %v1726_v25  ;;  %868 = vmatprep.subr.bf16.mxu1 %v1731_v27 }
 0x420   :  { %828 = vmatpush1.bf16.msra.mxu0 %v1729_v26  ;;  %869 = vmatpush1.bf16.msra.mxu1 %v1737_v29 }
 0x421   :  { %829 = vmatprep.subr.bf16.mxu0 %v1734_v28  ;;  %870 = vmatprep.subr.bf16.mxu1 %v1740_v30 }
 0x424   :  { %830 = vmatpush1.bf16.msra.mxu0 %v1745_v31  ;;  %871 = vmatpush1.bf16.msra.mxu1 %v1749_v32 }
 0x425   :  { %925 = vmatprep.subr.bf16.mxu0 %v1658_v1  ;;  %966 = vmatprep.subr.bf16.mxu1 %v1663_v3  ;;  %v703_v1 = vld [vmem:[#allocation4 + $0x98] sm:$0xff] }
 0x4c7   :  { %v739_v51 = vpop.f32.mrf.mxu0  ;;  %v780_v52 = vpop.f32.mrf.mxu1 }
 0x4c8   :  { %v787_v54 = vadd.f32 %v739_v51, %v700_v41  ;;  %v789_v35 = vadd.f32 %v780_v52, %v702_v59 }
 0x4c9   :  { %v741_v55 = vpop.f32.mrf.mxu0  ;;  %v782_v56 = vpop.f32.mrf.mxu1 }
 0x4ca   :  { %v791_v57 = vmul.f32 0.5, %v787_v54  ;;  %v788_v58 = vadd.f32 %v741_v55, %v701_v53  ;;  %v790_v3 = vadd.f32 %v782_v56, %v703_v1  ;;  %v1499_v1 = vld [vmem:[#allocation7 + $0xc0] ss:$16 sps:$4 sm:$0xff]  }
 0x4cb   :  { %v743_v60 = vpop.f32.mrf.mxu0  ;;  %v784_v61 = vpop.f32.mrf.mxu1 }
 0x4cc   :  { %1453 = vtanh.f32 %v791_v57  ;;  %v795_v63 = vmul.f32 0.5, %v788_v58  ;;  %v800_v37 = vmul.f32 0.5, %v790_v3  ;;  %v1500_v3 = vld [vmem:[#allocation7 + $0xc8] ss:$16 sps:$4 sm:$0xff]  }
 0x4cd   :  { %v744_v33 = vpop.f32.mrf.mxu0  ;;  %v785_v34 = vpop.f32.mrf.mxu1 }
 0x4ce   :  { %1455 = vtanh.f32 %v795_v63  ;;  %v1495_v63 = vld [vmem:[#allocation7 + $0xe0] ss:$16 sps:$4 sm:$0xff]   ;;  %v1496_v33 = vld [vmem:[#allocation7 + $0xe8] ss:$16 sps:$4 sm:$0xff]   ;;  %v1497_v34 = vld [vmem:[#allocation7 + $0xc4] ss:$16 sps:$4 sm:$0xff]  }
 0x4cf   :  { %1457 = vtanh.f32 %v789_v35  ;;  %v1498_v35 = vld [vmem:[#allocation7 + $0xcc] ss:$16 sps:$4 sm:$0xff]  }
 0x4d0   :  { %1459 = vtanh.f32 %v800_v37  ;;  %v1501_v37 = vld [vmem:[#allocation7 + $0xa4] ss:$16 sps:$4 sm:$0xff]  }
 0x4d9   :  { %v1454_v38 = vpop.eup %1453 }
 0x4da   :  { %v793_v39 = vmul.f32 0.5, %v1454_v38  ;;  %v1502_v38 = vld [vmem:[#allocation7 + $0xac] ss:$16 sps:$4 sm:$0xff]  }
 0x4db   :  { %v1456_v40 = vpop.eup %1455 }
 0x4dc   :  { %v794_v42 = vadd.f32 0.5, %v793_v39  ;;  %v797_v62 = vmul.f32 0.5, %v1456_v40  ;;  %v1458_v44 = vpop.eup %1457  ;;  %v1503_v39 = vld [vmem:[#allocation7 + $0xa0] ss:$16 sps:$4 sm:$0xff]   ;;  %v1504_v40 = vld [vmem:[#allocation7 + $0xa8] ss:$16 sps:$4 sm:$0xff]  }
 0x4dd   :  { %v1460_v48 = vpop.eup %1459 }
 0x4de   :  { %v798_v43 = vadd.f32 0.5, %v797_v62  ;;  %v805_v36 = vmul.f32 %v1458_v44, %v794_v42  ;;  %v802_v49 = vmul.f32 0.5, %v1460_v48  ;;  %v1505_v42 = vld [vmem:[#allocation7 + $0x84] ss:$16 sps:$4 sm:$0xff]   ;;  %v1506_v62 = vld [vmem:[#allocation7 + $0x8c] ss:$16 sps:$4 sm:$0xff]  }
 0x4df   :  { %v1508_v44 = vld [vmem:[#allocation7 + $0x88] ss:$16 sps:$4 sm:$0xff]   ;;  %v1513_v48 = vld [vmem:[#allocation7 + $0x44] ss:$16 sps:$4 sm:$0xff]  }
 0x4e0   :  { %v804_v46 = vmul.f32 %v798_v43, %v1904_v45  ;;  %v803_v50 = vadd.f32 0.5, %v802_v49  ;;  %v1507_v43 = vld [vmem:[#allocation7 + $0x80] ss:$16 sps:$4 sm:$0xff]   ;;  %v1514_v49 = vld [vmem:[#allocation7 + $0x4c] ss:$16 sps:$4 sm:$0xff]  }
 0x4e2   :  { %v1942_v47 = vadd.f32 %v805_v36, %v804_v46  ;;  %v1510_v46 = vld [vmem:[#allocation7 + $0x6c] ss:$16 sps:$4 sm:$0xff]   ;;  %v1511_v36 = vld [vmem:[#allocation7 + $0x60] ss:$16 sps:$4 sm:$0xff]  }
 0x4e4   :  { %1461 = vtanh.f32 %v1942_v47 }
 0x4f1   :  { %v1462_v41 = vpop.eup %1461 }
 0x4f2   :  { %v808_v51 = vmul.f32 %v1462_v41, %v803_v50  ;;  %v1515_v50 = vld [vmem:[#allocation7 + $0x40] ss:$16 sps:$4 sm:$0xff]   ;;  %v1516_v41 = vld [vmem:[#allocation7 + $0x48] ss:$16 sps:$4 sm:$0xff]  }
 0x4f4   :  { %v814_v52 = vpack.c.bf16 %v808_v51, %v808_v51  ;;  %v1517_v51 = vld [vmem:[#allocation7 + $0x24] ss:$16 sps:$4 sm:$0xff]  }
 0x4f6   :  { %848 = vmatmul.mubr.bf16.vlgmr.msra.gmra.mxu0 %v814_v52  ;;  %889 = vmatmul.mubr.bf16.vlgmr.msra.gmra.mxu1 %v814_v52  ;;  %v1518_v52 = vld [vmem:[#allocation7 + $0x2c] ss:$16 sps:$4 sm:$0xff]  }
 0x4f7   :  { %926 = vmatpush1.bf16.msra.mxu0 %v1660_v2  ;;  %967 = vmatpush1.bf16.msra.mxu1 %v1665_v4  ;;  %v1493_v2 = vld [vmem:[#allocation7 + $0xe4] ss:$16 sps:$4 sm:$0xff]   ;;  %v1494_v4 = vld [vmem:[#allocation7 + $0xec] ss:$16 sps:$4 sm:$0xff]  }
 0x4f8   :  { %927 = vmatprep.subr.bf16.mxu0 %v1668_v5  ;;  %968 = vmatprep.subr.bf16.mxu1 %v1673_v7  ;;  %v810_v5 = vld [vmem:[#allocation4 + $0xa0] sm:$0xff] }
 0x4f9   :  { %957 = vmatprep.mubr.bf16.mxu0 %v1617_v0  ;;  %998 = vmatprep.mubr.bf16.mxu1 %v1617_v0 }
 0x4fb   :  { %928 = vmatpush1.bf16.msra.mxu0 %v1670_v6  ;;  %969 = vmatpush1.bf16.msra.mxu1 %v1677_v8  ;;  %v811_v8 = vld [vmem:[#allocation4 + $0xa8] sm:$0xff] }
 0x4fc   :  { %929 = vmatprep.subr.bf16.mxu0 %v1680_v9  ;;  %970 = vmatprep.subr.bf16.mxu1 %v1685_v11 }
 0x4ff   :  { %930 = vmatpush1.bf16.msra.mxu0 %v1683_v10  ;;  %971 = vmatpush1.bf16.msra.mxu1 %v1691_v13 }
 0x500   :  { %931 = vmatprep.subr.bf16.mxu0 %v1688_v12  ;;  %972 = vmatprep.subr.bf16.mxu1 %v1694_v14  ;;  %v812_v14 = vld [vmem:[#allocation4 + $0xb0] sm:$0xff] }
 0x503   :  { %932 = vmatpush1.bf16.msra.mxu0 %v1697_v15  ;;  %973 = vmatpush1.bf16.msra.mxu1 %v1703_v17 }
 0x504   :  { %933 = vmatprep.subr.bf16.mxu0 %v1700_v16  ;;  %974 = vmatprep.subr.bf16.mxu1 %v1706_v18 }
 0x507   :  { %934 = vmatpush1.bf16.msra.mxu0 %v1709_v19  ;;  %975 = vmatpush1.bf16.msra.mxu1 %v1715_v21  ;;  %v813_v21 = vld [vmem:[#allocation4 + $0xb8] sm:$0xff] }
 0x508   :  { %935 = vmatprep.subr.bf16.mxu0 %v1712_v20  ;;  %976 = vmatprep.subr.bf16.mxu1 %v1718_v22 }
 0x50b   :  { %936 = vmatpush1.bf16.msra.mxu0 %v1721_v23  ;;  %977 = vmatpush1.bf16.msra.mxu1 %v1723_v24 }
 0x50c   :  { %937 = vmatprep.subr.bf16.mxu0 %v1726_v25  ;;  %978 = vmatprep.subr.bf16.mxu1 %v1731_v27 }
 0x50f   :  { %938 = vmatpush1.bf16.msra.mxu0 %v1729_v26  ;;  %979 = vmatpush1.bf16.msra.mxu1 %v1737_v29 }
 0x510   :  { %939 = vmatprep.subr.bf16.mxu0 %v1734_v28  ;;  %980 = vmatprep.subr.bf16.mxu1 %v1740_v30 }
 0x513   :  { %940 = vmatpush1.bf16.msra.mxu0 %v1745_v31  ;;  %981 = vmatpush1.bf16.msra.mxu1 %v1749_v32 }
 0x514   :  { %1035 = vmatprep.subr.bf16.mxu0 %v1493_v2  ;;  %1076 = vmatprep.subr.bf16.mxu1 %v1494_v4  ;;  %v1519_v2 = vld [vmem:[#allocation7 + $0x20] ss:$16 sps:$4 sm:$0xff]   ;;  %v1520_v4 = vld [vmem:[#allocation7 + $0x28] ss:$16 sps:$4 sm:$0xff]  }
 0x5b6   :  { %v849_v6 = vpop.f32.mrf.mxu0  ;;  %v890_v7 = vpop.f32.mrf.mxu1 }
 0x5b7   :  { %v897_v9 = vadd.f32 %v849_v6, %v810_v5  ;;  %v899_v20 = vadd.f32 %v890_v7, %v812_v14  ;;  %v1521_v5 = vld [vmem:[#allocation7 + $0x4] ss:$16 sps:$4 sm:$0xff]  }
 0x5b8   :  { %v851_v10 = vpop.f32.mrf.mxu0  ;;  %v892_v11 = vpop.f32.mrf.mxu1  ;;  %v920_v6 = vld [vmem:[#allocation4 + $0xc0] sm:$0xff] }
 0x5b9   :  { %v901_v12 = vmul.f32 0.5, %v897_v9  ;;  %v898_v13 = vadd.f32 %v851_v10, %v811_v8  ;;  %v900_v22 = vadd.f32 %v892_v11, %v813_v21  ;;  %v921_v9 = vld [vmem:[#allocation4 + $0xc8] sm:$0xff] }
 0x5ba   :  { %v853_v15 = vpop.f32.mrf.mxu0  ;;  %v894_v16 = vpop.f32.mrf.mxu1 }
 0x5bb   :  { %1463 = vtanh.f32 %v901_v12  ;;  %v905_v17 = vmul.f32 0.5, %v898_v13  ;;  %v910_v23 = vmul.f32 0.5, %v900_v22  ;;  %v922_v15 = vld [vmem:[#allocation4 + $0xd0] sm:$0xff] }
 0x5bc   :  { %v854_v18 = vpop.f32.mrf.mxu0  ;;  %v895_v19 = vpop.f32.mrf.mxu1 }
 0x5bd   :  { %1465 = vtanh.f32 %v905_v17 }
 0x5be   :  { %1467 = vtanh.f32 %v899_v20 }
 0x5bf   :  { %1469 = vtanh.f32 %v910_v23 }
 0x5c8   :  { %v1464_v24 = vpop.eup %1463 }
 0x5c9   :  { %v903_v25 = vmul.f32 0.5, %v1464_v24 }
 0x5ca   :  { %v1466_v26 = vpop.eup %1465 }
 0x5cb   :  { %v904_v27 = vadd.f32 0.5, %v903_v25  ;;  %v907_v28 = vmul.f32 0.5, %v1466_v26  ;;  %v1468_v45 = vpop.eup %1467 }
 0x5cc   :  { %v1470_v56 = vpop.eup %1469 }
 0x5cd   :  { %v908_v29 = vadd.f32 0.5, %v907_v28  ;;  %v915_v54 = vmul.f32 %v1468_v45, %v904_v27  ;;  %v912_v57 = vmul.f32 0.5, %v1470_v56 }
 0x5cf   :  { %v914_v53 = vmul.f32 %v908_v29, %v1942_v47  ;;  %v913_v58 = vadd.f32 0.5, %v912_v57  ;;  %v1512_v47 = vld [vmem:[#allocation7 + $0x68] ss:$16 sps:$4 sm:$0xff]  }
 0x5d1   :  { %v1978_v55 = vadd.f32 %v915_v54, %v914_v53 }
 0x5d3   :  { %1471 = vtanh.f32 %v1978_v55 }
 0x5e0   :  { %v1472_v59 = vpop.eup %1471 }
 0x5e1   :  { %v918_v60 = vmul.f32 %v1472_v59, %v913_v58 }
 0x5e3   :  { %v924_v61 = vpack.c.bf16 %v918_v60, %v918_v60 }
 0x5e5   :  { %958 = vmatmul.mubr.bf16.vlgmr.msra.gmra.mxu0 %v924_v61  ;;  %999 = vmatmul.mubr.bf16.vlgmr.msra.gmra.mxu1 %v924_v61  ;;  %v1405_v61 = vld [vmem:[#allocation9 + $0x38] sm:$0xff]  }
 0x5e6   :  { %1036 = vmatpush1.bf16.msra.mxu0 %v1495_v63  ;;  %1077 = vmatpush1.bf16.msra.mxu1 %v1496_v33  ;;  %v1619_v63 = vmov 0.0   ;;  %v1406_v33 = vld [vmem:[#allocation9 + $0x30] sm:$0xff]  }
 0x5e7   :  { %1037 = vmatprep.subr.bf16.mxu0 %v1497_v34  ;;  %1078 = vmatprep.subr.bf16.mxu1 %v1498_v35  ;;  %v1408_v34 = vld [vmem:[#allocation9 + $0x20] sm:$0xff]   ;;  %v1409_v35 = vld [vmem:[#allocation9 + $0x18] sm:$0xff]  }
 0x5e8   :  { %1067 = vmatprep.mubr.bf16.mxu0 %v1617_v0  ;;  %1108 = vmatprep.mubr.bf16.mxu1 %v1617_v0  ;;  %v1509_v0 = vld [vmem:[#allocation7 + $0x64] ss:$16 sps:$4 sm:$0xff]  }
 0x5ea   :  { %1038 = vmatpush1.bf16.msra.mxu0 %v1499_v1  ;;  %1079 = vmatpush1.bf16.msra.mxu1 %v1500_v3  ;;  %v1410_v1 = vld [vmem:[#allocation9 + $0x10] sm:$0xff]   ;;  %v1411_v3 = vld [vmem:[#allocation9 + $0x8] sm:$0xff]  }
 0x5eb   :  { %1039 = vmatprep.subr.bf16.mxu0 %v1501_v37  ;;  %1080 = vmatprep.subr.bf16.mxu1 %v1502_v38  ;;  %v1412_v37 = vld [vmem:[#allocation9] sm:$0xff]  }
 0x5ec   :  { %v1030_v38 = vld [vmem:[#allocation4 + $0xe0] sm:$0xff] }
 0x5ee   :  { %1040 = vmatpush1.bf16.msra.mxu0 %v1503_v39  ;;  %1081 = vmatpush1.bf16.msra.mxu1 %v1504_v40 }
 0x5ef   :  { %1041 = vmatprep.subr.bf16.mxu0 %v1505_v42  ;;  %1082 = vmatprep.subr.bf16.mxu1 %v1506_v62  ;;  %v1031_v42 = vld [vmem:[#allocation4 + $0xe8] sm:$0xff] }
 0x5f2   :  { %1042 = vmatpush1.bf16.msra.mxu0 %v1507_v43  ;;  %1083 = vmatpush1.bf16.msra.mxu1 %v1508_v44 }
 0x5f3   :  { %1043 = vmatprep.subr.bf16.mxu0 %v1509_v0  ;;  %1084 = vmatprep.subr.bf16.mxu1 %v1510_v46 }
 0x5f6   :  { %1044 = vmatpush1.bf16.msra.mxu0 %v1511_v36  ;;  %1085 = vmatpush1.bf16.msra.mxu1 %v1512_v47  ;;  %v1032_v36 = vld [vmem:[#allocation4 + $0xf0] sm:$0xff] }
 0x5f7   :  { %1045 = vmatprep.subr.bf16.mxu0 %v1513_v48  ;;  %1086 = vmatprep.subr.bf16.mxu1 %v1514_v49 }
 0x5fa   :  { %1046 = vmatpush1.bf16.msra.mxu0 %v1515_v50  ;;  %1087 = vmatpush1.bf16.msra.mxu1 %v1516_v41 }
 0x5fb   :  { %1047 = vmatprep.subr.bf16.mxu0 %v1517_v51  ;;  %1088 = vmatprep.subr.bf16.mxu1 %v1518_v52  ;;  %v1033_v52 = vld [vmem:[#allocation4 + $0xf8] sm:$0xff] }
 0x5fe   :  { %1048 = vmatpush1.bf16.msra.mxu0 %v1519_v2  ;;  %1089 = vmatpush1.bf16.msra.mxu1 %v1520_v4 }
 0x5ff   :  { %1049 = vmatprep.subr.bf16.mxu0 %v1521_v5  ;;  %1090 = vmatprep.subr.bf16.mxu1 %v1740_v30 }
 0x602   :  { %1050 = vmatpush1.bf16.msra.mxu0 %v1745_v31  ;;  %1091 = vmatpush1.bf16.msra.mxu1 %v1749_v32  ;;  %v923_v31 = vld [vmem:[#allocation4 + $0xd8] sm:$0xff] }
 0x603   :  { %1323 = vmatprep.subr.bf16.mxu0 %v1619_v63 }
 0x6a5   :  { %v959_v7 = vpop.f32.mrf.mxu0  ;;  %v1000_v8 = vpop.f32.mrf.mxu1 }
 0x6a6   :  { %v1007_v10 = vadd.f32 %v959_v7, %v920_v6  ;;  %v1009_v20 = vadd.f32 %v1000_v8, %v922_v15 }
 0x6a7   :  { %v961_v11 = vpop.f32.mrf.mxu0  ;;  %v1002_v12 = vpop.f32.mrf.mxu1 }
 0x6a8   :  { %v1011_v13 = vmul.f32 0.5, %v1007_v10  ;;  %v1008_v14 = vadd.f32 %v961_v11, %v921_v9  ;;  %v1010_v32 = vadd.f32 %v1002_v12, %v923_v31 }
 0x6a9   :  { %v963_v16 = vpop.f32.mrf.mxu0  ;;  %v1004_v17 = vpop.f32.mrf.mxu1 }
 0x6aa   :  { %1473 = vtanh.f32 %v1011_v13  ;;  %v1015_v18 = vmul.f32 0.5, %v1008_v14  ;;  %v1020_v21 = vmul.f32 0.5, %v1010_v32 }
 0x6ab   :  { %v964_v19 = vpop.f32.mrf.mxu0  ;;  %v1005_v30 = vpop.f32.mrf.mxu1 }
 0x6ac   :  { %1475 = vtanh.f32 %v1015_v18 }
 0x6ad   :  { %1477 = vtanh.f32 %v1009_v20  ;;  %v1305_v20 = vld [vmem:[%s2000_s3] ss:$0 sm:$0xff] }
 0x6ae   :  { %1479 = vtanh.f32 %v1020_v21 }
 0x6b7   :  { %v1474_v22 = vpop.eup %1473 }
 0x6b8   :  { %v1013_v23 = vmul.f32 0.5, %v1474_v22 }
 0x6b9   :  { %v1476_v24 = vpop.eup %1475 }
 0x6ba   :  { %v1014_v25 = vadd.f32 0.5, %v1013_v23  ;;  %v1017_v26 = vmul.f32 0.5, %v1476_v24  ;;  %v1478_v28 = vpop.eup %1477 }
 0x6bb   :  { %v1480_v54 = vpop.eup %1479 }
 0x6bc   :  { %v1018_v27 = vadd.f32 0.5, %v1017_v26  ;;  %v1025_v45 = vmul.f32 %v1478_v28, %v1014_v25  ;;  %v1022_v56 = vmul.f32 0.5, %v1480_v54 }
 0x6be   :  { %v1024_v29 = vmul.f32 %v1018_v27, %v1978_v55  ;;  %v1023_v57 = vadd.f32 0.5, %v1022_v56  ;;  %v1407_v55 = vld [vmem:[#allocation9 + $0x28] sm:$0xff]  }
 0x6c0   :  { %v1987_v53 = vadd.f32 %v1025_v45, %v1024_v29 }
 0x6c2   :  { %1481 = vtanh.f32 %v1987_v53 }
 0x6cf   :  { %v1482_v58 = vpop.eup %1481 }
 0x6d0   :  { %v1028_v59 = vmul.f32 %v1482_v58, %v1023_v57 }
 0x6d2   :  { %v1034_v60 = vpack.c.bf16 %v1028_v59, %v1028_v59 }
 0x6d4   :  { %1068 = vmatmul.mubr.bf16.vlgmr.msra.gmra.mxu0 %v1034_v60  ;;  %1109 = vmatmul.mubr.bf16.vlgmr.msra.gmra.mxu1 %v1034_v60 }
 0x6d5   :  { %1324 = vmatpush3.bf16.msra.mxu0 %v1405_v61  ;;  %1339 = vmatprep.mubr.msk.bf16.mxu0 %vm1620_vm0, %v1619_v63 }
 0x6d6   :  { %1325 = vmatprep.subr.bf16.mxu0 %v1619_v63 }
 0x6d9   :  { %1326 = vmatpush3.bf16.msra.mxu0 %v1406_v33 }
 0x6da   :  { %1327 = vmatprep.subr.bf16.mxu0 %v1619_v63 }
 0x6dd   :  { %1328 = vmatpush3.bf16.msra.mxu0 %v1407_v55 }
 0x6de   :  { %1329 = vmatprep.subr.bf16.mxu0 %v1619_v63 }
 0x6e1   :  { %1330 = vmatpush3.bf16.msra.mxu0 %v1408_v34 }
 0x6e2   :  { %1331 = vmatprep.subr.bf16.mxu0 %v1619_v63 }
 0x6e5   :  { %1332 = vmatpush3.bf16.msra.mxu0 %v1409_v35 }
 0x6e6   :  { %1333 = vmatprep.subr.bf16.mxu0 %v1619_v63 }
 0x6e9   :  { %1334 = vmatpush3.bf16.msra.mxu0 %v1410_v1 }
 0x6ea   :  { %1335 = vmatprep.subr.bf16.mxu0 %v1619_v63 }
 0x6ed   :  { %1336 = vmatpush3.bf16.msra.mxu0 %v1411_v3 }
 0x6ee   :  { %1337 = vmatprep.subr.bf16.mxu0 %v1619_v63 }
 0x6f1   :  { %1338 = vmatpush3.bf16.msra.mxu0 %v1412_v37 }
 0x794   :  { %v1069_v39 = vpop.f32.mrf.mxu0  ;;  %v1110_v40 = vpop.f32.mrf.mxu1 }
 0x795   :  { %v1117_v62 = vadd.f32 %v1069_v39, %v1030_v38  ;;  %v1119_v51 = vadd.f32 %v1110_v40, %v1032_v36 }
 0x796   :  { %v1071_v43 = vpop.f32.mrf.mxu0  ;;  %v1112_v44 = vpop.f32.mrf.mxu1 }
 0x797   :  { %v1121_v0 = vmul.f32 0.5, %v1117_v62  ;;  %v1118_v46 = vadd.f32 %v1071_v43, %v1031_v42  ;;  %v1120_v2 = vadd.f32 %v1112_v44, %v1033_v52 }
 0x798   :  { %v1073_v47 = vpop.f32.mrf.mxu0  ;;  %v1114_v48 = vpop.f32.mrf.mxu1 }
 0x799   :  { %1483 = vtanh.f32 %v1121_v0  ;;  %v1125_v49 = vmul.f32 0.5, %v1118_v46  ;;  %v1130_v4 = vmul.f32 0.5, %v1120_v2 }
 0x79a   :  { %v1074_v50 = vpop.f32.mrf.mxu0  ;;  %v1115_v41 = vpop.f32.mrf.mxu1 }
 0x79b   :  { %1485 = vtanh.f32 %v1125_v49 }
 0x79c   :  { %1487 = vtanh.f32 %v1119_v51 }
 0x79d   :  { %1489 = vtanh.f32 %v1130_v4 }
 0x7a6   :  { %v1484_v5 = vpop.eup %1483 }
 0x7a7   :  { %v1123_v6 = vmul.f32 0.5, %v1484_v5 }
 0x7a8   :  { %v1486_v7 = vpop.eup %1485 }
 0x7a9   :  { %v1124_v8 = vadd.f32 0.5, %v1123_v6  ;;  %v1127_v9 = vmul.f32 0.5, %v1486_v7  ;;  %v1488_v11 = vpop.eup %1487 }
 0x7aa   :  { %v1490_v15 = vpop.eup %1489 }
 0x7ab   :  { %v1128_v10 = vadd.f32 0.5, %v1127_v9  ;;  %v1135_v13 = vmul.f32 %v1488_v11, %v1124_v8  ;;  %v1132_v16 = vmul.f32 0.5, %v1490_v15 }
 0x7ad   :  { %v1134_v12 = vmul.f32 %v1128_v10, %v1987_v53  ;;  %v1133_v17 = vadd.f32 0.5, %v1132_v16 }
 0x7af   :  { %v1136_v14 = vadd.f32 %v1135_v13, %v1134_v12 }
 0x7b1   :  { %1491 = vtanh.f32 %v1136_v14 }
 0x7be   :  { %v1492_v18 = vpop.eup %1491 }
 0x7bf   :  { %v1138_v19 = vmul.f32 %v1492_v18, %v1133_v17 }
 0x7c1   :  { %v1144_v30 = vpack.c.bf16 %v1138_v19, %v1138_v19 }
 0x7c3   :  { %1340 = vmatmul.mubr.bf16.vlgmr.msra.gmra.mxu0 %v1144_v30 }
 0x883   :  { %v1250_v31 = vpop.f32.mrf.mxu0 }
 0x884   :  { %v1251_v32 = vadd.f32 %v1305_v20, %v1250_v31 }
 0x885   :  { %v1341_v21 = vpop.f32.mrf.mxu0 }
 0x886   :  { %1256 = vst [vmem:[#allocation10] sm:$0xff] %v1251_v32 }
 0x887   :  { %v1253_v22 = vpop.f32.mrf.mxu0 }
 0x888   :  { %1593 = shalt.err (!%p1590_p5)
}
 0x889   :  { %1266 = dma.vmem_to_hbm [thread:$0]  %s1264_s10, 128, %s2001_s4, [#allocation6]   ;;  %v1342_v23 = vpop.f32.mrf.mxu0 }
 0x88a   :  { %1606 = dma.done.wait [#allocation6], 128  }
 0x88b   :  { %1607 = vsyncadd [#allocation6], 4294967168 }
 0x88c   :  { %1270 = vsyncpa [#allocation5], 1 }
 0x88d   :  { %1271 = vsyncpa [#allocation8], 1 }
 0x88e   :  { %1272 = vsyncpa [#allocation6], 1 }

</bundles_post_ra>
